<compile_context>
chip_gen: v5e
topology: v5e:2x2
jax: 0.10.0
libtpu: 0.0.40
codegen_flags: <defaults>
</compile_context>

<pallas_src>
import math

import jax
import jax.numpy as jnp
from jax.experimental import pallas as pl
from jax.experimental.pallas import tpu as pltpu


def _round_up(x, m):
    return ((x + m - 1) // m) * m


def _lcm(a, b):
    return a * b // math.gcd(a, b)


def rgin_kernel(xs_ref, xd_ref, a_ref, wsl_ref, bias0_ref,
                w1_ref, s1_ref, w2_ref, out_ref, agg_ref):
    """Grid = (dst_tile i [parallel], relation r, src_tile k); r, k sequential."""
    r = pl.program_id(1)
    k = pl.program_id(2)
    nk = pl.num_programs(2)

    # First step for this dst row tile: self-loop linear + all folded biases
    # (bsl + sum_r b2[r]) initialize the resident f32 output accumulator.
    @pl.when((r == 0) & (k == 0))
    def _():
        out_ref[...] = (
            jnp.dot(xd_ref[...], wsl_ref[...], preferred_element_type=jnp.float32)
            + bias0_ref[...])

    # New relation: reset the partial-aggregate scratch.
    @pl.when(k == 0)
    def _():
        agg_ref[...] = jnp.zeros_like(agg_ref)

    # Partial neighbor aggregation over this source tile.  int8 counts are
    # upcast to bf16 on the VPU (free under the MXU/DMA bound) for the MXU.
    a = a_ref[...].astype(jnp.bfloat16)
    agg_ref[...] += jnp.dot(a, xs_ref[...], preferred_element_type=jnp.float32)

    # Last source tile: GINConv MLP for relation r (eps=0; eval-mode BN and the
    # first bias are folded into w1/shift1), accumulated into the output tile.
    @pl.when(k == nk - 1)
    def _():
        h = (xd_ref[...].astype(jnp.float32) + agg_ref[...]).astype(jnp.bfloat16)
        h1 = jnp.dot(h, w1_ref[r], preferred_element_type=jnp.float32) + s1_ref[r]
        hr = jnp.maximum(h1, 0.0).astype(jnp.bfloat16)                       # ReLU
        out_ref[...] += jnp.dot(hr, w2_ref[r], preferred_element_type=jnp.float32)


def _vmem_budget_bytes():
    """Generation-aware VMEM budget: ~75% of physical, capped at 100 MiB."""
    cap = None
    try:
        cap = getattr(pltpu.get_tpu_info(), "vmem_capacity_bytes", None)
    except Exception:
        cap = None
    if not cap:
        cap = 64 << 20  # conservative fallback: v7x per-TensorCore VMEM
    return min(int(cap) * 3 // 4, 100 << 20)


def _pick_tiles(N, F_in_p, F_out_p, R, budget):
    """Largest (tile_m, tile_k) whose resident working set fits the VMEM budget."""

    def working_set(tm, tk):
        return (2 * tm * tk                     # int8 adjacency tiles (double buffered)
                + 2 * tk * F_in_p * 2           # bf16 src-row x tiles
                + 2 * tm * F_in_p * 2           # bf16 dst-row x tiles
                + F_in_p * F_out_p * 2          # Wsl (single buffered)
                + F_out_p * 4                   # folded bias0
                + R * F_in_p * F_out_p * 2      # resident W1'
                + R * F_out_p * 4               # resident shift1
                + R * F_out_p * F_out_p * 2     # resident W2
                + 2 * tm * F_out_p * 4          # f32 output tile
                + tm * F_in_p * 4)              # f32 agg scratch

    tm = next((c for c in (512, 256, 128, 64, 32) if c <= _round_up(N, 32)), 32)
    tk = next((c for c in (512, 256, 128) if c <= _round_up(N, 128)), 128)
    while working_set(tm, tk) > budget and (tm > 32 or tk > 128):
        if tk >= tm and tk > 128:
            tk //= 2
        elif tm > 32:
            tm //= 2
        else:
            tk //= 2
    # Megacore (v7x): prefer >= 2 dst tiles so the "parallel" axis can split
    # across both TensorCores.
    while _round_up(N, _lcm(tm, tk)) // tm < 2 and tm > 32:
        tm //= 2
    return tm, tk


def rgin_conv(x, adj, Wsl, bsl, W1, b1, bn_scale, bn_shift, W2, b2,
              *, tile_m=None, tile_k=None):
    """out = x@Wsl + bsl + sum_r [ReLU(((x + A_r x)@W1_r + b1_r)*s_r + t_r)@W2_r + b2_r]."""
    N, F_in = x.shape
    F_out = Wsl.shape[1]
    R = adj.shape[0]

    F_in_p = _round_up(F_in, 128)
    F_out_p = _round_up(F_out, 128)

    budget = _vmem_budget_bytes()
    auto_m, auto_k = _pick_tiles(N, F_in_p, F_out_p, R, budget)
    tile_m = auto_m if tile_m is None else tile_m
    tile_k = auto_k if tile_k is None else tile_k
    assert tile_m % 32 == 0, "tile_m must be a multiple of 32 (int8 sublane tiling)"
    assert tile_k % 128 == 0, "tile_k must be a multiple of 128 (lane tiling)"

    N_p = _round_up(N, _lcm(tile_m, tile_k))
    num_i = N_p // tile_m
    num_k = N_p // tile_k

    f32, bf16 = jnp.float32, jnp.bfloat16

    # ---- int8 adjacency (dominant HBM stream); counts must be exact in int8 ----
    # (wrapper is eager here; skip/replace this check if you jit the wrapper)
    assert int(jnp.max(adj)) <= 127, "edge multiplicity > 127 not exact in int8 adjacency"
    adj_p = jnp.pad(adj.astype(jnp.int32), ((0, 0), (0, N_p - N), (0, N_p - N)))
    adj_p = adj_p.astype(jnp.int8)

    # ---- pad + fold parameters (MXU operands bf16, additive terms f32) ----
    x_p = jnp.pad(x, ((0, N_p - N), (0, F_in_p - F_in))).astype(bf16)

    Wsl_p = jnp.pad(Wsl, ((0, F_in_p - F_in), (0, F_out_p - F_out))).astype(bf16)
    bias0 = jnp.pad(bsl + jnp.sum(b2, axis=0), (0, F_out_p - F_out))
    bias0 = bias0.astype(f32).reshape(1, F_out_p)

    W1f = W1 * bn_scale[:, None, :]                                   # fold BN scale
    W1f = jnp.pad(W1f, ((0, 0), (0, F_in_p - F_in), (0, F_out_p - F_out))).astype(bf16)
    shift1 = (b1 * bn_scale + bn_shift).astype(f32)                   # fold b1 + BN shift
    shift1 = jnp.pad(shift1, ((0, 0), (0, F_out_p - F_out))).reshape(R, 1, F_out_p)
    W2_p = jnp.pad(W2, ((0, 0), (0, F_out_p - F_out), (0, F_out_p - F_out))).astype(bf16)

    flops = int(
        2 * N_p * F_in_p * F_out_p                       # self-loop linear
        + R * (2 * N_p * N_p * F_in_p                    # A_r @ x
               + 2 * N_p * F_in_p * F_out_p              # W1'
               + 2 * N_p * F_out_p * F_out_p))           # W2
    bytes_accessed = int(
        adj_p.size                                        # int8 adjacency stream
        + num_i * R * N_p * F_in_p * 2                    # src x tiles (per dst tile & rel)
        + N_p * F_in_p * 2                                # dst x tiles
        + (Wsl_p.size + W1f.size + W2_p.size) * 2         # resident weights (once)
        + N_p * F_out_p * 4)                              # f32 output

    def build_call(single_buffer):
        def inv_spec(shape, index_map):
            # Grid-invariant blocks: single-buffer them (double-buffering a
            # constant block is pure VMEM waste).
            if single_buffer:
                return pl.BlockSpec(shape, index_map, pipeline_mode=pl.Buffered(1))
            return pl.BlockSpec(shape, index_map)

        grid_spec = pltpu.PrefetchScalarGridSpec(
            num_scalar_prefetch=0,
            grid=(num_i, R, num_k),            # r, k last => sequential accumulation
            in_specs=[
                pl.BlockSpec((tile_k, F_in_p), lambda i, r, k: (k, 0)),      # x, src rows
                pl.BlockSpec((tile_m, F_in_p), lambda i, r, k: (i, 0)),      # x, dst rows
                pl.BlockSpec((None, tile_m, tile_k),
                             lambda i, r, k: (r, i, k)),                     # adj[r] tile, int8
                inv_spec((F_in_p, F_out_p), lambda i, r, k: (0, 0)),         # Wsl
                inv_spec((1, F_out_p), lambda i, r, k: (0, 0)),              # folded bias0
                inv_spec((R, F_in_p, F_out_p), lambda i, r, k: (0, 0, 0)),   # W1' (all rel.)
                inv_spec((R, 1, F_out_p), lambda i, r, k: (0, 0, 0)),        # shift1
                inv_spec((R, F_out_p, F_out_p), lambda i, r, k: (0, 0, 0)),  # W2 (all rel.)
            ],
            out_specs=pl.BlockSpec((tile_m, F_out_p), lambda i, r, k: (i, 0)),
            scratch_shapes=[pltpu.VMEM((tile_m, F_in_p), f32)],              # agg accumulator
        )
        return pl.pallas_call(
            rgin_kernel,
            out_shape=jax.ShapeDtypeStruct((N_p, F_out_p), f32),
            grid_spec=grid_spec,
            compiler_params=pltpu.CompilerParams(
                dimension_semantics=("parallel", "arbitrary", "arbitrary"),
                vmem_limit_bytes=budget),
            cost_estimate=pl.CostEstimate(
                flops=flops, transcendentals=0, bytes_accessed=bytes_accessed),
        )

    args = (x_p, x_p, adj_p, Wsl_p, bias0, W1f, shift1, W2_p)
    try:
        out_p = build_call(single_buffer=True)(*args)
    except Exception:
        # pipeline_mode=pl.Buffered(1) unsupported on this jax version: fall
        # back to default double buffering (identical numerics, slightly more VMEM).
        out_p = build_call(single_buffer=False)(*args)

    return out_p[:N, :F_out]


def build_adjacency(edge_index, edge_type, num_nodes, num_relations):
    """A[r, dst, src] = number of edges src->dst with edge_type == r (int counts)."""
    src = edge_index[0]
    dst = edge_index[1]
    A = jnp.zeros((num_relations, num_nodes, num_nodes), jnp.int32)
    return A.at[edge_type, dst, src].add(1)


def ref_forward(x, adj, Wsl, bsl, W1, b1, bn_scale, bn_shift, W2, b2):
    adj = adj.astype(x.dtype)
    out = x @ Wsl + bsl
    for r in range(adj.shape[0]):
        h = x + adj[r] @ x
        h1 = h @ W1[r] + b1[r]
        hb = h1 * bn_scale[r] + bn_shift[r]
        hr = jnp.maximum(hb, 0.0)
        out = out + hr @ W2[r] + b2[r]
    return out


if __name__ == "__main__":
    # Small but multi-tile problem: N nodes, F_in -> F_out, R relations, E edges.
    N, F_in, F_out, R, E = 200, 16, 32, 3, 600

    key = jax.random.PRNGKey(0)
    keys = jax.random.split(key, 12)

    x = jax.random.normal(keys[0], (N, F_in), jnp.float32)
    src = jax.random.randint(keys[1], (E,), 0, N)
    dst = jax.random.randint(keys[2], (E,), 0, N)
    edge_index = jnp.stack([src, dst], axis=0)               # [2, E]
    edge_type = jax.random.randint(keys[3], (E,), 0, R)      # [E]

    # Parameters (deterministic init; Linear stored as [in, out] so y = x @ W + b).
    Wsl = jax.random.normal(keys[4], (F_in, F_out), jnp.float32) * 0.1
    bsl = jax.random.normal(keys[5], (F_out,), jnp.float32) * 0.1
    W1 = jax.random.normal(keys[6], (R, F_in, F_out), jnp.float32) * 0.1
    b1 = jax.random.normal(keys[7], (R, F_out), jnp.float32) * 0.1
    W2 = jax.random.normal(keys[8], (R, F_out, F_out), jnp.float32) * 0.1
    b2 = jax.random.normal(keys[9], (R, F_out), jnp.float32) * 0.1

    # Eval-mode BatchNorm1d params folded to scale/shift.
    gamma = 1.0 + 0.1 * jax.random.normal(keys[10], (R, F_out), jnp.float32)
    beta = 0.1 * jax.random.normal(keys[11], (R, F_out), jnp.float32)
    running_mean = jnp.zeros((R, F_out), jnp.float32)
    running_var = jnp.ones((R, F_out), jnp.float32)
    bn_eps = 1e-5
    bn_scale = gamma / jnp.sqrt(running_var + bn_eps)
    bn_shift = beta - running_mean * bn_scale

    adj = build_adjacency(edge_index, edge_type, N, R)
    ref = ref_forward(x, adj, Wsl, bsl, W1, b1, bn_scale, bn_shift, W2, b2)

    # Explicit small tiles: N_p = 256 => grid = (4, 3, 2), exercising the
    # multi dst-tile "parallel" axis and multi src-tile (K) accumulation.
    out = rgin_conv(x, adj, Wsl, bsl, W1, b1, bn_scale, bn_shift, W2, b2,
                    tile_m=64, tile_k=128)
    out = jax.block_until_ready(out)
    assert out.shape == (N, F_out)
    # bf16 MXU inputs with f32 accumulation vs an all-f32 reference.
    err = float(jnp.max(jnp.abs(out - ref)))
    assert jnp.allclose(out, ref, atol=5e-2, rtol=5e-2), (
        f"explicit-tile mismatch vs JAX reference, max abs err = {err}")

    # Auto tiling path (VMEM-budgeted, generation-aware heuristic).
    out_auto = rgin_conv(x, adj, Wsl, bsl, W1, b1, bn_scale, bn_shift, W2, b2)
    out_auto = jax.block_until_ready(out_auto)
    err_auto = float(jnp.max(jnp.abs(out_auto - ref)))
    assert jnp.allclose(out_auto, ref, atol=5e-2, rtol=5e-2), (
        f"auto-tile mismatch vs JAX reference, max abs err = {err_auto}")

    print("KERNEL_OK")
</pallas_src>

<mosaic_0001>
module attributes {stable_mosaic.version = 11 : i64} {
  func.func @rgin_kernel(%arg0: i32, %arg1: i32, %arg2: i32, %arg3: memref<128x128xbf16, #tpu.memory_space<vmem>>, %arg4: memref<64x128xbf16, #tpu.memory_space<vmem>>, %arg5: memref<1x64x128xi8, #tpu.memory_space<vmem>>, %arg6: memref<128x128xbf16, #tpu.memory_space<vmem>>, %arg7: memref<1x128xf32, #tpu.memory_space<vmem>>, %arg8: memref<3x128x128xbf16, #tpu.memory_space<vmem>>, %arg9: memref<3x1x128xf32, #tpu.memory_space<vmem>>, %arg10: memref<3x128x128xbf16, #tpu.memory_space<vmem>>, %arg11: memref<64x128xf32, #tpu.memory_space<vmem>>, %arg12: memref<64x128xf32, #tpu.memory_space<vmem>>) attributes {dimension_semantics = [#tpu.dimension_semantics<parallel>, #tpu.dimension_semantics<arbitrary>, #tpu.dimension_semantics<arbitrary>], iteration_bounds = array<i64: 4, 3, 2>, scalar_prefetch = 0 : i64, scratch_operands = 1 : i64, tpu.core_type = #tpu.core_type<tc>, window_params = [{transform_indices = @transform_0, window_bounds = array<i64: 128, 128>}, {transform_indices = @transform_1, window_bounds = array<i64: 64, 128>}, {transform_indices = @transform_2, window_bounds = array<i64: 1, 64, 128>}, {pipeline_mode = #tpu.pipeline_mode<synchronous>, transform_indices = @transform_3, window_bounds = array<i64: 128, 128>}, {pipeline_mode = #tpu.pipeline_mode<synchronous>, transform_indices = @transform_4, window_bounds = array<i64: 1, 128>}, {pipeline_mode = #tpu.pipeline_mode<synchronous>, transform_indices = @transform_5, window_bounds = array<i64: 3, 128, 128>}, {pipeline_mode = #tpu.pipeline_mode<synchronous>, transform_indices = @transform_6, window_bounds = array<i64: 3, 1, 128>}, {pipeline_mode = #tpu.pipeline_mode<synchronous>, transform_indices = @transform_7, window_bounds = array<i64: 3, 128, 128>}, {transform_indices = @transform_8, window_bounds = array<i64: 64, 128>}]} {
    %c0_i32 = arith.constant 0 : i32
    %0 = arith.cmpi eq, %arg1, %c0_i32 : i32
    %c0_i32_0 = arith.constant 0 : i32
    %1 = arith.cmpi eq, %arg2, %c0_i32_0 : i32
    %2 = arith.andi %0, %1 : i1
    %3 = arith.extui %2 : i1 to i32
    %c0_i32_1 = arith.constant 0 : i32
    %4 = arith.cmpi ne, %3, %c0_i32_1 : i32
    scf.if %4 {
      %c0_13 = arith.constant 0 : index
      %c0_14 = arith.constant 0 : index
      %19 = vector.load %arg4[%c0_13, %c0_14] : memref<64x128xbf16, #tpu.memory_space<vmem>>, vector<64x128xbf16>
      %c0_15 = arith.constant 0 : index
      %c0_16 = arith.constant 0 : index
      %20 = vector.load %arg6[%c0_15, %c0_16] : memref<128x128xbf16, #tpu.memory_space<vmem>>, vector<128x128xbf16>
      %cst_17 = arith.constant dense<0.000000e+00> : vector<64x128xf32>
      %21 = tpu.matmul %19, %20, %cst_17 {dimension_numbers = #tpu.dot_dimension_numbers<[1], [0], [0], [1], [0, 0, 1, 1], [], []>} : vector<64x128xbf16>, vector<128x128xbf16>, vector<64x128xf32> -> vector<64x128xf32>
      %c0_18 = arith.constant 0 : index
      %c0_19 = arith.constant 0 : index
      %22 = vector.load %arg7[%c0_18, %c0_19] : memref<1x128xf32, #tpu.memory_space<vmem>>, vector<1x128xf32>
      %23 = vector.broadcast %22 : vector<1x128xf32> to vector<64x128xf32>
      %24 = arith.addf %21, %23 : vector<64x128xf32>
      %c0_20 = arith.constant 0 : index
      %c0_21 = arith.constant 0 : index
      %25 = vector.load %arg11[%c0_20, %c0_21] : memref<64x128xf32, #tpu.memory_space<vmem>>, vector<64x128xf32>
      tpu.vector_store %arg11[%c0_20, %c0_21], %24 {strides = array<i32>} : memref<64x128xf32, #tpu.memory_space<vmem>>, vector<64x128xf32>,
    } else {
    }
    %c0_i32_2 = arith.constant 0 : i32
    %5 = arith.cmpi eq, %arg2, %c0_i32_2 : i32
    %6 = arith.extui %5 : i1 to i32
    %c0_i32_3 = arith.constant 0 : i32
    %7 = arith.cmpi ne, %6, %c0_i32_3 : i32
    scf.if %7 {
      %cst_13 = arith.constant 0.000000e+00 : f32
      %19 = vector.broadcast %cst_13 : f32 to vector<64x128xf32>
      %c0_14 = arith.constant 0 : index
      %c0_15 = arith.constant 0 : index
      %20 = vector.load %arg12[%c0_14, %c0_15] : memref<64x128xf32, #tpu.memory_space<vmem>>, vector<64x128xf32>
      tpu.vector_store %arg12[%c0_14, %c0_15], %19 {strides = array<i32>} : memref<64x128xf32, #tpu.memory_space<vmem>>, vector<64x128xf32>,
    } else {
    }
    %c0 = arith.constant 0 : index
    %c0_4 = arith.constant 0 : index
    %c0_5 = arith.constant 0 : index
    %8 = vector.load %arg5[%c0, %c0_4, %c0_5] : memref<1x64x128xi8, #tpu.memory_space<vmem>>, vector<1x64x128xi8>
    %9 = vector.shape_cast %8 : vector<1x64x128xi8> to vector<64x128xi8>
    %10 = arith.sitofp %9 : vector<64x128xi8> to vector<64x128xbf16>
    %c0_6 = arith.constant 0 : index
    %c0_7 = arith.constant 0 : index
    %11 = vector.load %arg12[%c0_6, %c0_7] : memref<64x128xf32, #tpu.memory_space<vmem>>, vector<64x128xf32>
    %c0_8 = arith.constant 0 : index
    %c0_9 = arith.constant 0 : index
    %12 = vector.load %arg3[%c0_8, %c0_9] : memref<128x128xbf16, #tpu.memory_space<vmem>>, vector<128x128xbf16>
    %cst = arith.constant dense<0.000000e+00> : vector<64x128xf32>
    %13 = tpu.matmul %10, %12, %cst {dimension_numbers = #tpu.dot_dimension_numbers<[1], [0], [0], [1], [0, 0, 1, 1], [], []>} : vector<64x128xbf16>, vector<128x128xbf16>, vector<64x128xf32> -> vector<64x128xf32>
    %14 = arith.addf %11, %13 : vector<64x128xf32>
    %c0_10 = arith.constant 0 : index
    %c0_11 = arith.constant 0 : index
    %15 = vector.load %arg12[%c0_10, %c0_11] : memref<64x128xf32, #tpu.memory_space<vmem>>, vector<64x128xf32>
    tpu.vector_store %arg12[%c0_10, %c0_11], %14 {strides = array<i32>} : memref<64x128xf32, #tpu.memory_space<vmem>>, vector<64x128xf32>,
    %c1_i32 = arith.constant 1 : i32
    %16 = arith.cmpi eq, %arg2, %c1_i32 : i32
    %17 = arith.extui %16 : i1 to i32
    %c0_i32_12 = arith.constant 0 : i32
    %18 = arith.cmpi ne, %17, %c0_i32_12 : i32
    scf.if %18 {
      %c0_13 = arith.constant 0 : index
      %c0_14 = arith.constant 0 : index
      %19 = vector.load %arg4[%c0_13, %c0_14] : memref<64x128xbf16, #tpu.memory_space<vmem>>, vector<64x128xbf16>
      %20 = arith.extf %19 : vector<64x128xbf16> to vector<64x128xf32>
      %c0_15 = arith.constant 0 : index
      %c0_16 = arith.constant 0 : index
      %21 = vector.load %arg12[%c0_15, %c0_16] : memref<64x128xf32, #tpu.memory_space<vmem>>, vector<64x128xf32>
      %22 = arith.addf %20, %21 : vector<64x128xf32>
      %23 = arith.truncf %22 : vector<64x128xf32> to vector<64x128xbf16>
      %24 = arith.index_cast %arg1 : i32 to index
      %c0_17 = arith.constant 0 : index
      %c0_18 = arith.constant 0 : index
      %25 = vector.load %arg8[%24, %c0_17, %c0_18] : memref<3x128x128xbf16, #tpu.memory_space<vmem>>, vector<1x128x128xbf16>
      %26 = vector.shape_cast %25 : vector<1x128x128xbf16> to vector<128x128xbf16>
      %cst_19 = arith.constant dense<0.000000e+00> : vector<64x128xf32>
      %27 = tpu.matmul %23, %26, %cst_19 {dimension_numbers = #tpu.dot_dimension_numbers<[1], [0], [0], [1], [0, 0, 1, 1], [], []>} : vector<64x128xbf16>, vector<128x128xbf16>, vector<64x128xf32> -> vector<64x128xf32>
      %28 = arith.index_cast %arg1 : i32 to index
      %c0_20 = arith.constant 0 : index
      %c0_21 = arith.constant 0 : index
      %29 = vector.load %arg9[%28, %c0_20, %c0_21] : memref<3x1x128xf32, #tpu.memory_space<vmem>>, vector<1x1x128xf32>
      %30 = vector.shape_cast %29 : vector<1x1x128xf32> to vector<1x128xf32>
      %31 = vector.broadcast %30 : vector<1x128xf32> to vector<64x128xf32>
      %32 = arith.addf %27, %31 : vector<64x128xf32>
      %cst_22 = arith.constant 0.000000e+00 : f32
      %33 = vector.broadcast %cst_22 : f32 to vector<64x128xf32>
      %34 = arith.maximumf %32, %33 : vector<64x128xf32>
      %35 = arith.truncf %34 : vector<64x128xf32> to vector<64x128xbf16>
      %c0_23 = arith.constant 0 : index
      %c0_24 = arith.constant 0 : index
      %36 = vector.load %arg11[%c0_23, %c0_24] : memref<64x128xf32, #tpu.memory_space<vmem>>, vector<64x128xf32>
      %37 = arith.index_cast %arg1 : i32 to index
      %c0_25 = arith.constant 0 : index
      %c0_26 = arith.constant 0 : index
      %38 = vector.load %arg10[%37, %c0_25, %c0_26] : memref<3x128x128xbf16, #tpu.memory_space<vmem>>, vector<1x128x128xbf16>
      %39 = vector.shape_cast %38 : vector<1x128x128xbf16> to vector<128x128xbf16>
      %cst_27 = arith.constant dense<0.000000e+00> : vector<64x128xf32>
      %40 = tpu.matmul %35, %39, %cst_27 {dimension_numbers = #tpu.dot_dimension_numbers<[1], [0], [0], [1], [0, 0, 1, 1], [], []>} : vector<64x128xbf16>, vector<128x128xbf16>, vector<64x128xf32> -> vector<64x128xf32>
      %41 = arith.addf %36, %40 : vector<64x128xf32>
      %c0_28 = arith.constant 0 : index
      %c0_29 = arith.constant 0 : index
      %42 = vector.load %arg11[%c0_28, %c0_29] : memref<64x128xf32, #tpu.memory_space<vmem>>, vector<64x128xf32>
      tpu.vector_store %arg11[%c0_28, %c0_29], %41 {strides = array<i32>} : memref<64x128xf32, #tpu.memory_space<vmem>>, vector<64x128xf32>,
    } else {
    }
    return
  }
  func.func @transform_0(%arg0: i32, %arg1: i32, %arg2: i32) -> (i32, i32) {
    %c0_i32 = arith.constant 0 : i32
    %c0_i32_0 = arith.constant 0 : i32
    return %arg2, %c0_i32 : i32, i32
  }
  func.func @transform_1(%arg0: i32, %arg1: i32, %arg2: i32) -> (i32, i32) {
    %c0_i32 = arith.constant 0 : i32
    %c0_i32_0 = arith.constant 0 : i32
    return %arg0, %c0_i32 : i32, i32
  }
  func.func @transform_2(%arg0: i32, %arg1: i32, %arg2: i32) -> (i32, i32, i32) {
    %c0_i32 = arith.constant 0 : i32
    return %arg1, %arg0, %arg2 : i32, i32, i32
  }
  func.func @transform_3(%arg0: i32, %arg1: i32, %arg2: i32) -> (i32, i32) {
    %c0_i32 = arith.constant 0 : i32
    %c0_i32_0 = arith.constant 0 : i32
    %c0_i32_1 = arith.constant 0 : i32
    return %c0_i32, %c0_i32_0 : i32, i32
  }
  func.func @transform_4(%arg0: i32, %arg1: i32, %arg2: i32) -> (i32, i32) {
    %c0_i32 = arith.constant 0 : i32
    %c0_i32_0 = arith.constant 0 : i32
    %c0_i32_1 = arith.constant 0 : i32
    return %c0_i32, %c0_i32_0 : i32, i32
  }
  func.func @transform_5(%arg0: i32, %arg1: i32, %arg2: i32) -> (i32, i32, i32) {
    %c0_i32 = arith.constant 0 : i32
    %c0_i32_0 = arith.constant 0 : i32
    %c0_i32_1 = arith.constant 0 : i32
    %c0_i32_2 = arith.constant 0 : i32
    return %c0_i32, %c0_i32_0, %c0_i32_1 : i32, i32, i32
  }
  func.func @transform_6(%arg0: i32, %arg1: i32, %arg2: i32) -> (i32, i32, i32) {
    %c0_i32 = arith.constant 0 : i32
    %c0_i32_0 = arith.constant 0 : i32
    %c0_i32_1 = arith.constant 0 : i32
    %c0_i32_2 = arith.constant 0 : i32
    return %c0_i32, %c0_i32_0, %c0_i32_1 : i32, i32, i32
  }
  func.func @transform_7(%arg0: i32, %arg1: i32, %arg2: i32) -> (i32, i32, i32) {
    %c0_i32 = arith.constant 0 : i32
    %c0_i32_0 = arith.constant 0 : i32
    %c0_i32_1 = arith.constant 0 : i32
    %c0_i32_2 = arith.constant 0 : i32
    return %c0_i32, %c0_i32_0, %c0_i32_1 : i32, i32, i32
  }
  func.func @transform_8(%arg0: i32, %arg1: i32, %arg2: i32) -> (i32, i32) {
    %c0_i32 = arith.constant 0 : i32
    %c0_i32_0 = arith.constant 0 : i32
    return %arg0, %c0_i32 : i32, i32
  }
}

module attributes {stable_mosaic.version = 11 : i64} {
  func.func @rgin_kernel(%arg0: i32, %arg1: i32, %arg2: i32, %arg3: memref<128x128xbf16, #tpu.memory_space<vmem>>, %arg4: memref<64x128xbf16, #tpu.memory_space<vmem>>, %arg5: memref<1x64x128xi8, #tpu.memory_space<vmem>>, %arg6: memref<128x128xbf16, #tpu.memory_space<vmem>>, %arg7: memref<1x128xf32, #tpu.memory_space<vmem>>, %arg8: memref<3x128x128xbf16, #tpu.memory_space<vmem>>, %arg9: memref<3x1x128xf32, #tpu.memory_space<vmem>>, %arg10: memref<3x128x128xbf16, #tpu.memory_space<vmem>>, %arg11: memref<64x128xf32, #tpu.memory_space<vmem>>, %arg12: memref<64x128xf32, #tpu.memory_space<vmem>>) attributes {dimension_semantics = [#tpu.dimension_semantics<parallel>, #tpu.dimension_semantics<arbitrary>, #tpu.dimension_semantics<arbitrary>], iteration_bounds = array<i64: 4, 3, 2>, scalar_prefetch = 0 : i64, scratch_operands = 1 : i64, tpu.core_type = #tpu.core_type<tc>, window_params = [{transform_indices = @transform_0, window_bounds = array<i64: 128, 128>}, {transform_indices = @transform_1, window_bounds = array<i64: 64, 128>}, {transform_indices = @transform_2, window_bounds = array<i64: 1, 64, 128>}, {pipeline_mode = #tpu.pipeline_mode<synchronous>, transform_indices = @transform_3, window_bounds = array<i64: 128, 128>}, {pipeline_mode = #tpu.pipeline_mode<synchronous>, transform_indices = @transform_4, window_bounds = array<i64: 1, 128>}, {pipeline_mode = #tpu.pipeline_mode<synchronous>, transform_indices = @transform_5, window_bounds = array<i64: 3, 128, 128>}, {pipeline_mode = #tpu.pipeline_mode<synchronous>, transform_indices = @transform_6, window_bounds = array<i64: 3, 1, 128>}, {pipeline_mode = #tpu.pipeline_mode<synchronous>, transform_indices = @transform_7, window_bounds = array<i64: 3, 128, 128>}, {transform_indices = @transform_8, window_bounds = array<i64: 64, 128>}]} {
    %c0_i32 = arith.constant 0 : i32
    %0 = arith.cmpi eq, %arg1, %c0_i32 : i32
    %c0_i32_0 = arith.constant 0 : i32
    %1 = arith.cmpi eq, %arg2, %c0_i32_0 : i32
    %2 = arith.andi %0, %1 : i1
    %3 = arith.extui %2 : i1 to i32
    %c0_i32_1 = arith.constant 0 : i32
    %4 = arith.cmpi ne, %3, %c0_i32_1 : i32
    scf.if %4 {
      %c0_13 = arith.constant 0 : index
      %c0_14 = arith.constant 0 : index
      %19 = vector.load %arg4[%c0_13, %c0_14] : memref<64x128xbf16, #tpu.memory_space<vmem>>, vector<64x128xbf16>
      %c0_15 = arith.constant 0 : index
      %c0_16 = arith.constant 0 : index
      %20 = vector.load %arg6[%c0_15, %c0_16] : memref<128x128xbf16, #tpu.memory_space<vmem>>, vector<128x128xbf16>
      %cst_17 = arith.constant dense<0.000000e+00> : vector<64x128xf32>
      %21 = tpu.matmul %19, %20, %cst_17 {dimension_numbers = #tpu.dot_dimension_numbers<[1], [0], [0], [1], [0, 0, 1, 1], [], []>} : vector<64x128xbf16>, vector<128x128xbf16>, vector<64x128xf32> -> vector<64x128xf32>
      %c0_18 = arith.constant 0 : index
      %c0_19 = arith.constant 0 : index
      %22 = vector.load %arg7[%c0_18, %c0_19] : memref<1x128xf32, #tpu.memory_space<vmem>>, vector<1x128xf32>
      %23 = vector.broadcast %22 : vector<1x128xf32> to vector<64x128xf32>
      %24 = arith.addf %21, %23 : vector<64x128xf32>
      %c0_20 = arith.constant 0 : index
      %c0_21 = arith.constant 0 : index
      %25 = vector.load %arg11[%c0_20, %c0_21] : memref<64x128xf32, #tpu.memory_space<vmem>>, vector<64x128xf32>
      tpu.vector_store %arg11[%c0_20, %c0_21], %24 {strides = array<i32>} : memref<64x128xf32, #tpu.memory_space<vmem>>, vector<64x128xf32>,
    } else {
    }
    %c0_i32_2 = arith.constant 0 : i32
    %5 = arith.cmpi eq, %arg2, %c0_i32_2 : i32
    %6 = arith.extui %5 : i1 to i32
    %c0_i32_3 = arith.constant 0 : i32
    %7 = arith.cmpi ne, %6, %c0_i32_3 : i32
    scf.if %7 {
      %cst_13 = arith.constant 0.000000e+00 : f32
      %19 = vector.broadcast %cst_13 : f32 to vector<64x128xf32>
      %c0_14 = arith.constant 0 : index
      %c0_15 = arith.constant 0 : index
      %20 = vector.load %arg12[%c0_14, %c0_15] : memref<64x128xf32, #tpu.memory_space<vmem>>, vector<64x128xf32>
      tpu.vector_store %arg12[%c0_14, %c0_15], %19 {strides = array<i32>} : memref<64x128xf32, #tpu.memory_space<vmem>>, vector<64x128xf32>,
    } else {
    }
    %c0 = arith.constant 0 : index
    %c0_4 = arith.constant 0 : index
    %c0_5 = arith.constant 0 : index
    %8 = vector.load %arg5[%c0, %c0_4, %c0_5] : memref<1x64x128xi8, #tpu.memory_space<vmem>>, vector<1x64x128xi8>
    %9 = vector.shape_cast %8 : vector<1x64x128xi8> to vector<64x128xi8>
    %10 = arith.sitofp %9 : vector<64x128xi8> to vector<64x128xbf16>
    %c0_6 = arith.constant 0 : index
    %c0_7 = arith.constant 0 : index
    %11 = vector.load %arg12[%c0_6, %c0_7] : memref<64x128xf32, #tpu.memory_space<vmem>>, vector<64x128xf32>
    %c0_8 = arith.constant 0 : index
    %c0_9 = arith.constant 0 : index
    %12 = vector.load %arg3[%c0_8, %c0_9] : memref<128x128xbf16, #tpu.memory_space<vmem>>, vector<128x128xbf16>
    %cst = arith.constant dense<0.000000e+00> : vector<64x128xf32>
    %13 = tpu.matmul %10, %12, %cst {dimension_numbers = #tpu.dot_dimension_numbers<[1], [0], [0], [1], [0, 0, 1, 1], [], []>} : vector<64x128xbf16>, vector<128x128xbf16>, vector<64x128xf32> -> vector<64x128xf32>
    %14 = arith.addf %11, %13 : vector<64x128xf32>
    %c0_10 = arith.constant 0 : index
    %c0_11 = arith.constant 0 : index
    %15 = vector.load %arg12[%c0_10, %c0_11] : memref<64x128xf32, #tpu.memory_space<vmem>>, vector<64x128xf32>
    tpu.vector_store %arg12[%c0_10, %c0_11], %14 {strides = array<i32>} : memref<64x128xf32, #tpu.memory_space<vmem>>, vector<64x128xf32>,
    %c1_i32 = arith.constant 1 : i32
    %16 = arith.cmpi eq, %arg2, %c1_i32 : i32
    %17 = arith.extui %16 : i1 to i32
    %c0_i32_12 = arith.constant 0 : i32
    %18 = arith.cmpi ne, %17, %c0_i32_12 : i32
    scf.if %18 {
      %c0_13 = arith.constant 0 : index
      %c0_14 = arith.constant 0 : index
      %19 = vector.load %arg4[%c0_13, %c0_14] : memref<64x128xbf16, #tpu.memory_space<vmem>>, vector<64x128xbf16>
      %20 = arith.extf %19 : vector<64x128xbf16> to vector<64x128xf32>
      %c0_15 = arith.constant 0 : index
      %c0_16 = arith.constant 0 : index
      %21 = vector.load %arg12[%c0_15, %c0_16] : memref<64x128xf32, #tpu.memory_space<vmem>>, vector<64x128xf32>
      %22 = arith.addf %20, %21 : vector<64x128xf32>
      %23 = arith.truncf %22 : vector<64x128xf32> to vector<64x128xbf16>
      %24 = arith.index_cast %arg1 : i32 to index
      %c0_17 = arith.constant 0 : index
      %c0_18 = arith.constant 0 : index
      %25 = vector.load %arg8[%24, %c0_17, %c0_18] : memref<3x128x128xbf16, #tpu.memory_space<vmem>>, vector<1x128x128xbf16>
      %26 = vector.shape_cast %25 : vector<1x128x128xbf16> to vector<128x128xbf16>
      %cst_19 = arith.constant dense<0.000000e+00> : vector<64x128xf32>
      %27 = tpu.matmul %23, %26, %cst_19 {dimension_numbers = #tpu.dot_dimension_numbers<[1], [0], [0], [1], [0, 0, 1, 1], [], []>} : vector<64x128xbf16>, vector<128x128xbf16>, vector<64x128xf32> -> vector<64x128xf32>
      %28 = arith.index_cast %arg1 : i32 to index
      %c0_20 = arith.constant 0 : index
      %c0_21 = arith.constant 0 : index
      %29 = vector.load %arg9[%28, %c0_20, %c0_21] : memref<3x1x128xf32, #tpu.memory_space<vmem>>, vector<1x1x128xf32>
      %30 = vector.shape_cast %29 : vector<1x1x128xf32> to vector<1x128xf32>
      %31 = vector.broadcast %30 : vector<1x128xf32> to vector<64x128xf32>
      %32 = arith.addf %27, %31 : vector<64x128xf32>
      %cst_22 = arith.constant 0.000000e+00 : f32
      %33 = vector.broadcast %cst_22 : f32 to vector<64x128xf32>
      %34 = arith.maximumf %32, %33 : vector<64x128xf32>
      %35 = arith.truncf %34 : vector<64x128xf32> to vector<64x128xbf16>
      %c0_23 = arith.constant 0 : index
      %c0_24 = arith.constant 0 : index
      %36 = vector.load %arg11[%c0_23, %c0_24] : memref<64x128xf32, #tpu.memory_space<vmem>>, vector<64x128xf32>
      %37 = arith.index_cast %arg1 : i32 to index
      %c0_25 = arith.constant 0 : index
      %c0_26 = arith.constant 0 : index
      %38 = vector.load %arg10[%37, %c0_25, %c0_26] : memref<3x128x128xbf16, #tpu.memory_space<vmem>>, vector<1x128x128xbf16>
      %39 = vector.shape_cast %38 : vector<1x128x128xbf16> to vector<128x128xbf16>
      %cst_27 = arith.constant dense<0.000000e+00> : vector<64x128xf32>
      %40 = tpu.matmul %35, %39, %cst_27 {dimension_numbers = #tpu.dot_dimension_numbers<[1], [0], [0], [1], [0, 0, 1, 1], [], []>} : vector<64x128xbf16>, vector<128x128xbf16>, vector<64x128xf32> -> vector<64x128xf32>
      %41 = arith.addf %36, %40 : vector<64x128xf32>
      %c0_28 = arith.constant 0 : index
      %c0_29 = arith.constant 0 : index
      %42 = vector.load %arg11[%c0_28, %c0_29] : memref<64x128xf32, #tpu.memory_space<vmem>>, vector<64x128xf32>
      tpu.vector_store %arg11[%c0_28, %c0_29], %41 {strides = array<i32>} : memref<64x128xf32, #tpu.memory_space<vmem>>, vector<64x128xf32>,
    } else {
    }
    return
  }
  func.func @transform_0(%arg0: i32, %arg1: i32, %arg2: i32) -> (i32, i32) {
    %c0_i32 = arith.constant 0 : i32
    %c0_i32_0 = arith.constant 0 : i32
    return %arg2, %c0_i32 : i32, i32
  }
  func.func @transform_1(%arg0: i32, %arg1: i32, %arg2: i32) -> (i32, i32) {
    %c0_i32 = arith.constant 0 : i32
    %c0_i32_0 = arith.constant 0 : i32
    return %arg0, %c0_i32 : i32, i32
  }
  func.func @transform_2(%arg0: i32, %arg1: i32, %arg2: i32) -> (i32, i32, i32) {
    %c0_i32 = arith.constant 0 : i32
    return %arg1, %arg0, %arg2 : i32, i32, i32
  }
  func.func @transform_3(%arg0: i32, %arg1: i32, %arg2: i32) -> (i32, i32) {
    %c0_i32 = arith.constant 0 : i32
    %c0_i32_0 = arith.constant 0 : i32
    %c0_i32_1 = arith.constant 0 : i32
    return %c0_i32, %c0_i32_0 : i32, i32
  }
  func.func @transform_4(%arg0: i32, %arg1: i32, %arg2: i32) -> (i32, i32) {
    %c0_i32 = arith.constant 0 : i32
    %c0_i32_0 = arith.constant 0 : i32
    %c0_i32_1 = arith.constant 0 : i32
    return %c0_i32, %c0_i32_0 : i32, i32
  }
  func.func @transform_5(%arg0: i32, %arg1: i32, %arg2: i32) -> (i32, i32, i32) {
    %c0_i32 = arith.constant 0 : i32
    %c0_i32_0 = arith.constant 0 : i32
    %c0_i32_1 = arith.constant 0 : i32
    %c0_i32_2 = arith.constant 0 : i32
    return %c0_i32, %c0_i32_0, %c0_i32_1 : i32, i32, i32
  }
  func.func @transform_6(%arg0: i32, %arg1: i32, %arg2: i32) -> (i32, i32, i32) {
    %c0_i32 = arith.constant 0 : i32
    %c0_i32_0 = arith.constant 0 : i32
    %c0_i32_1 = arith.constant 0 : i32
    %c0_i32_2 = arith.constant 0 : i32
    return %c0_i32, %c0_i32_0, %c0_i32_1 : i32, i32, i32
  }
  func.func @transform_7(%arg0: i32, %arg1: i32, %arg2: i32) -> (i32, i32, i32) {
    %c0_i32 = arith.constant 0 : i32
    %c0_i32_0 = arith.constant 0 : i32
    %c0_i32_1 = arith.constant 0 : i32
    %c0_i32_2 = arith.constant 0 : i32
    return %c0_i32, %c0_i32_0, %c0_i32_1 : i32, i32, i32
  }
  func.func @transform_8(%arg0: i32, %arg1: i32, %arg2: i32) -> (i32, i32) {
    %c0_i32 = arith.constant 0 : i32
    %c0_i32_0 = arith.constant 0 : i32
    return %arg0, %c0_i32 : i32, i32
  }
}

</mosaic_0001>

<bundles_post_ra>
// kernel: tpu_custom_call.1
= control target key start
LH: loop header
LB: loop body
LE: loop exit
PB: predicated region body
PF: predicated region fallthrough
CT: control target
= control target key end

     0   :  { %s2597_s0 = inlined_call_operand.hbm [shape: bf16[256,128], index: 0, kind: input, shape index: {}]   ;;  %s2598_s1 = inlined_call_operand.hbm [shape: bf16[256,128], index: 1, kind: input, shape index: {}]   ;;  %s2599_s2 = inlined_call_operand.hbm [shape: s8[3,256,256], index: 2, kind: input, shape index: {}]   ;;  %s2600_s3 = inlined_call_operand.hbm [shape: bf16[128,128], index: 3, kind: input, shape index: {}]   ;;  %s2601_s4 = inlined_call_operand.vmem [shape: f32[1,128], index: 4, kind: input, shape index: {}]   ;;  %s2602_s5 = inlined_call_operand.hbm [shape: bf16[3,128,128], index: 5, kind: input, shape index: {}]   ;;  %s2603_s6 = inlined_call_operand.vmem [shape: f32[3,1,128], index: 6, kind: input, shape index: {}]   ;;  %s2604_s7 = inlined_call_operand.hbm [shape: bf16[3,128,128], index: 7, kind: input, shape index: {}]   ;;  %s2605_s8 = inlined_call_operand.hbm [shape: f32[256,128], index: 8, kind: output, shape index: {}]  }
   0x1   :  { %2625 = sst [smem:[#allocation35_spill]] %s2597_s0 }
   0x2   :  { %2626 = sst [smem:[#allocation36_spill]] %s2598_s1 }
   0x3   :  { %2627 = sst [smem:[#allocation37_spill]] %s2600_s3 }
   0x4   :  { %2628 = sst [smem:[#allocation38_spill]] %s2601_s4 }
   0x5   :  { %2629 = sst [smem:[#allocation39_spill]] %s2602_s5 }
   0x6   :  { %2630 = sst [smem:[#allocation40_spill]] %s2603_s6 }
   0x7   :  { %2631 = sst [smem:[#allocation41_spill]] %s2604_s7 }
   0x8   :  { %2632 = sst [smem:[#allocation42_spill]] %s2605_s8 }
   0x9   :  { %13 = vsyncpa [#allocation4], 0 }
   0xa   :  { %15 = vsyncpa [#allocation4 + $0x1], 0 }
   0xb   :  { %16 = vsyncpa [#allocation7], 0 }
   0xc   :  { %18 = vsyncpa [#allocation7 + $0x1], 0 }
   0xd   :  { %19 = vsyncpa [#allocation10], 0 }
   0xe   :  { %20 = vsyncpa [#allocation13], 0 }
   0xf   :  { %21 = vsyncpa [#allocation5], 0 }
  0x10   :  { %23 = vsyncpa [#allocation5 + $0x1], 0  ;;  %s2154_s27 = smov 0   ;;  %s2156_s28 = smov 0  }
  0x11   :  { %s2158_s29 = smov 0   ;;  %s2160_s30 = smov 0  }
  0x12   :  { %s2162_s9 = smov 0   ;;  %s2164_s10 = smov 0  }
  0x13   :  { %s2166_s11 = smov 0   ;;  %s2168_s12 = smov 0  }
  0x14   :  { %s2170_s13 = smov 0   ;;  %s2172_s14 = smov 0  }
  0x15   :  { %s2174_s15 = smov 0   ;;  %s2176_s16 = smov 0  }
  0x16   :  { %s2178_s17 = smov 0   ;;  %s2180_s18 = smov 0  }
  0x17   :  { %s2182_s19 = smov 0   ;;  %s2184_s20 = smov 0  }
  0x18 LB: > { %2633 = sst [smem:[#allocation21_spill]] %s2048_s30  ;;  %s2235_s21 = sadd.s32 4294967295, %s2096_s20   ;;  %s2096_s20 = sphi %s2184_s20, %s29_s20   ;;  %s2092_s19 = sphi %s2182_s19, %s2700_s19   ;;  %s2088_s18 = sphi %s2180_s18, %s2699_s18   ;;  %s2084_s17 = sphi %s2178_s17, %s2698_s17   ;;  %s2080_s16 = sphi %s2176_s16, %s2697_s16   ;;  %s2076_s15 = sphi %s2174_s15, %s2696_s15   ;;  %s2072_s14 = sphi %s2172_s14, %s2695_s14   ;;  %s2068_s13 = sphi %s2170_s13, %s2694_s13   ;;  %s2064_s12 = sphi %s2168_s12, %s2693_s12   ;;  %s2060_s11 = sphi %s2166_s11, %s2692_s11   ;;  %s2056_s10 = sphi %s2164_s10, %s2691_s10   ;;  %s2052_s9 = sphi %s2162_s9, %s2690_s9   ;;  %s2048_s30 = sphi %s2160_s30, %s2681_s30   ;;  %s2044_s29 = sphi %s2158_s29, %s2689_s29   ;;  %s2040_s28 = sphi %s2156_s28, %s2688_s28   ;;  %s2036_s27 = sphi %s2154_s27, %s2687_s27  }
  0x19   : > { %2634 = sst [smem:[#allocation22_spill]] %s2052_s9  ;;  %p1242_p0 = scmp.ge.s32.totalorder %s2096_s20, 1 }
  0x1a   : > { %2635 = sst [smem:[#allocation23_spill]] %s2068_s13  ;;  %p69_p1 = scmp.eq.s32.totalorder %s2235_s21, 0 }
  0x1b   : > { %2636 = sst [smem:[#allocation24_spill]] %s2072_s14  ;;  %p266_p2 = scmp.lt.s32.totalorder %s2096_s20, 25 }
  0x1c   : > { %2637 = sst [smem:[#allocation25_spill]] %s2076_s15  ;;  %s2098_s26 = smov [#allocation9]  }
  0x1d   : > { %2638 = sst [smem:[#allocation26_spill]] %s2080_s16  ;;  %p2243_p3 = pnand %p1242_p0, %p266_p2 }
  0x1e   : > { %s2639_s3 = sld [smem:[#allocation37_spill]]  ;;  %s279_s8 = sshll.u32 %s2098_s26, 4  ;;  %s280_s8 = int_to_ptr.vmem [resolvable:$true] %s279_s8 }
  0x1f   : > { %s2640_s25 = scalar_select %p2243_p3, 1, 0 }
  0x20   : > { %p1565_p4 = pneg %p2243_p3  ;;  %s2608_s23 = smov 64  }
  0x21   : > { %2641 = sst [smem:[#allocation27_spill]] %s2640_s25  ;;  %s1241_s16 = sadd.s32 4294967294, %s2096_s20  }
  0x22   : > { %p2251_p5 = pnand %p1565_p4, %p69_p1  ;;  %p63_p6 = scmp.eq.s32.totalorder %s2096_s20, 0 }
  0x23   : > { %p88_p7 = scmp.ne.s32.totalorder %s2056_s10, %s2052_s9  ;;  %p94_p8 = scmp.ne.s32.totalorder %s2052_s9, %s2048_s30 }
  0x24   : > { %s277_s24 = sshll.u32 %s2639_s3, 4  ;;  %s2610_s3 = smov 4   ;;  %s278_s24 = int_to_ptr.hbm [resolvable:$true] %s277_s24 }
  0x25   : > { %1568 = dma.hbm_to_vmem [thread:$0]  (!%p2251_p5), %s278_s24, 1024, %s280_s8, [#allocation10], %s2608_s23, %s2608_s23, %s2610_s3  }
  0x26   : > { %p253_p9 = scmp.eq.s32.totalorder %s2235_s21, 23  ;;  %p2271_p10 = por %p88_p7, %p63_p6 }
  0x27   : > { %p259_p11 = scmp.eq.s32.totalorder %s1241_s16, 23  ;;  %p2277_p12 = por %p94_p8, %p69_p1 }
  0x28   : > { %p2281_p13 = por %p253_p9, %p88_p7  ;;  %p1592_p2 = scmp.lt.s32.totalorder %s2096_s20, 24 }
  0x29   : > { %s2644_s14 = scalar_select %p2277_p12, 1, 0 }
  0x2a   : > { %s2646_s8 = scalar_select %p2281_p13, 1, 0 }
  0x2b   : > { %2645 = sst [smem:[#allocation28_spill]] %s2644_s14  ;;  %p2285_p0 = por %p259_p11, %p94_p8 }
  0x2c   : > { %2647 = sst [smem:[#allocation29_spill]] %s2646_s8  ;;  %s349_s6 = sand.u32 1, %s2096_s20  }
  0x2d   : > { %s2648_s24 = scalar_select %p2285_p0, 1, 0 }
  0x2e   : > { %s351_s26 = sand.u32 1, %s2056_s10   ;;  %s1421_s3 = sshll.u32 %s2092_s19, 5 }
  0x2f   : > { %2649 = sst [smem:[#allocation30_spill]] %s2648_s24  ;;  %s1250_s23 = sshll.u32 %s351_s26, 5 }
  0x30   : > { %s2650_s1 = sld [smem:[#allocation36_spill]]  ;;  %s353_s9 = scalar_lea.vmem [#allocation6], %s1250_s23 }
  0x31   : > { %s361_s14 = sshll.u32 %s353_s9, 4  ;;  %p1579_p4 = pnand %p1592_p2, %p2271_p10  ;;  %s362_s14 = int_to_ptr.vmem [resolvable:$true] %s361_s14 }
  0x32   : > { %s2651_s5 = sld [smem:[#allocation39_spill]]  ;;  %s2303_s30 = scalar_lea.sflag [#allocation7], %s349_s6 }
  0x33   : > { %s2653_s23 = smov 64   ;;  %s2101_s4 = smov [#allocation11]  }
  0x34   : > { %s296_s9 = sshll.u32 %s2101_s4, 4  ;;  %s2654_s7 = sld [smem:[#allocation41_spill]]  ;;  %s297_s9 = int_to_ptr.vmem [resolvable:$true] %s296_s9 }
  0x35   : > { %s2102_s6 = smov [#allocation12]   ;;  %s44_s24 = sadd.s32 1, %s2088_s18 }
  0x36   : > { %s358_s15 = scalar_lea.hbm %s2650_s1, %s1421_s3  ;;  %s2652_s3 = smov 4  }
  0x37   : > { %s359_s25 = sshll.u32 %s358_s15, 4  ;;  %p62_p8 = scmp.ne.s32.totalorder %s2068_s13, %s2064_s12  ;;  %s360_s25 = int_to_ptr.hbm [resolvable:$true] %s359_s25 }
  0x38   : > { %s294_s26 = sshll.u32 %s2651_s5, 4  ;;  %p68_p11 = scmp.ne.s32.totalorder %s2064_s12, %s2060_s11  ;;  %s295_s26 = int_to_ptr.hbm [resolvable:$true] %s294_s26 }
  0x39   : > { %1581 = dma.hbm_to_vmem [thread:$0]  (!%p1579_p4), %s360_s25, 512, %s362_s14, %s2303_s30, %s2653_s23, %s2653_s23, %s2652_s3  }
  0x3a   : > { %s311_s8 = sshll.u32 %s2654_s7, 4  ;;  %s313_s14 = sshll.u32 %s2102_s6, 4  ;;  %s312_s8 = int_to_ptr.hbm [resolvable:$true] %s311_s8  ;;  %s314_s14 = int_to_ptr.vmem [resolvable:$true] %s313_s14 }
  0x3b   : > { %1571 = dma.hbm_to_vmem [thread:$0]  (!%p2251_p5), %s295_s26, 3072, %s297_s9, [#allocation10], %s2653_s23, %s2653_s23, %s2652_s3  }
  0x3c   : > { %1574 = dma.hbm_to_vmem [thread:$0]  (!%p2251_p5), %s312_s8, 3072, %s314_s14, [#allocation13], %s2653_s23, %s2653_s23, %s2652_s3  }
  0x3d   : > { %s41_s25 = sadd.s32 1, %s2084_s17  ;;  %s55_s26 = sadd.s32 1, %s2068_s13 }
  0x3e   : > { %p42_p7 = scmp.ge.s32.totalorder %s41_s25, 2  ;;  %p2334_p9 = por %p63_p6, %p62_p8 }
  0x3f   : > { %s327_s9 = sand.u32 1, %s2068_s13   ;;  %s2658_s15 = sadd.s32 1, %s2092_s19 }
  0x40   : > { %s2702_s25 = smov (%p42_p7, %s41_s25), 0  ;;  %s2704_s24 = smov (!%p42_p7, %s44_s24), %s2088_s18 }
  0x41   : > { %2655 = sst [smem:[#allocation31_spill]] %s2702_s25  ;;  %s52_s22 = ssub.s32 %s2084_s17, %s2702_s25 }
  0x42   : > { %p46_p5 = scmp.ge.s32.totalorder %s2704_s24, 3  ;;  %p53_p10 = scmp.eq.s32.totalorder %s52_s22, 0 }
  0x43   : > { %p2351_p7 = por %p69_p1, %p68_p11  ;;  %s1247_s11 = sshll.u32 %s327_s9, 6 }
  0x44   : > { %s2706_s24 = smov (%p46_p5, %s2704_s24), 0  ;;  %s2708_s15 = smov (!%p46_p5, %s2658_s15), %s2092_s19 }
  0x45   : > { %2657 = sst [smem:[#allocation32_spill]] %s2706_s24  ;;  %p50_p4 = scmp.ge.s32.totalorder %s2708_s15, 4 }
  0x46   : > { %s2347_s16 = scalar_select %p53_p10, %s2068_s13, %s55_s26  }
  0x47   : > { %s104_s6 = ssub.s32 %s2088_s18, %s2706_s24  ;;  %s2710_s15 = smov (%p50_p4, %s2708_s15), 0 }
  0x48   : > { %2659 = sst [smem:[#allocation33_spill]] %s2347_s16  ;;  %s1420_s14 = sshll.u32 %s2084_s17, 6 }
  0x49   : > { %2661 = sst [smem:[#allocation34_spill]] %s2710_s15  ;;  %s78_s1 = ssub.s32 %s2092_s19, %s2710_s15 }
  0x4a   : > { %p79_p8 = scmp.eq.s32.totalorder %s78_s1, 0  ;;  %s106_s26 = sor.u32 %s104_s6, %s78_s1 }
  0x4b   : > { %s108_s5 = sor.u32 %s106_s26, %s52_s22  ;;  %s2662_s0 = sld [smem:[#allocation35_spill]] }
  0x4c   : > { %s2663_s16 = sadd.s32 1, %s2056_s10  ;;  %p109_p5 = scmp.eq.s32.totalorder %s108_s5, 0 }
  0x4d   : > { %s2368_s13 = scalar_select %p79_p8, %s2056_s10, %s2663_s16  }
  0x4e   : > { %s331_s1 = scalar_lea.vmem [#allocation3], %s1247_s11  ;;  %p1576_p10 = pnand %p1592_p2, %p2334_p9 }
  0x4f   : > { %s339_s22 = sshll.u32 %s331_s1, 4  ;;  %s1422_s7 = sshll.u32 %s2092_s19, 2  ;;  %s340_s22 = int_to_ptr.vmem [resolvable:$true] %s339_s22 }
  0x50   : > { %s380_s25 = sadd.s32 %s2084_s17, %s1422_s7  ;;  %s328_s6 = scalar_lea.sflag [#allocation4], %s327_s9 }
  0x51   : > { %s336_s24 = scalar_lea.hbm %s2662_s0, %s1420_s14  ;;  %s111_s16 = sadd.s32 1, %s2044_s29 }
  0x52   : > { %s337_s15 = sshll.u32 %s336_s24, 4  ;;  %p118_p11 = scmp.ne.s32.totalorder %s2044_s29, %s2040_s28  ;;  %s338_s15 = int_to_ptr.hbm [resolvable:$true] %s337_s15 }
  0x53   : > { %1578 = dma.hbm_to_vmem [thread:$0]  (!%p1576_p10), %s338_s15, 1024, %s340_s22, %s328_s6, %s2653_s23, %s2653_s23, %s2652_s3  }
  0x54   : > { %s2381_s5 = scalar_select %p109_p5, %s2044_s29, %s111_s16  }
  0x55   : > { %p124_p4 = scmp.ne.s32.totalorder %s2040_s28, %s2036_s27  ;;  %s373_s24 = sand.u32 1, %s2044_s29  }
  0x56   : > { %s1256_s11 = sshll.u32 %s2088_s18, 4  ;;  %p120_p8 = por %p118_p11, %p63_p6 }
  0x57   : > { %p2393_p9 = por %p124_p4, %p69_p1  ;;  %s1253_s9 = sshll.u32 %s373_s24, 4 }
  0x58   : > { %s382_s14 = sadd.s32 %s1256_s11, %s380_s25  ;;  %s375_s1 = scalar_lea.vmem [#allocation8], %s1253_s9 }
  0x59   : > { %s1257_s26 = sshll.u32 %s382_s14, 3  ;;  %s387_s22 = sshll.u32 %s375_s1, 4  ;;  %s388_s22 = int_to_ptr.vmem [resolvable:$true] %s387_s22 }
  0x5a   : > { %s384_s15 = scalar_lea.hbm %s2599_s2, %s1257_s26  ;;  %p1582_p5 = pnand %p1592_p2, %p120_p8 }
  0x5b   : > { %s385_s27 = sshll.u32 %s384_s15, 4  ;;  %s2103_s7 = smov 256   ;;  %s386_s27 = int_to_ptr.hbm [resolvable:$true] %s385_s27 }
  0x5c   : > { %s2104_s6 = smov 128   ;;  %s2105_s16 = smov 8  }
  0x5d   : > { %1584 = dma.hbm_to_vmem [thread:$0]  (!%p1582_p5), %s386_s27, 256, %s388_s22, %s2303_s30, %s2103_s7, %s2104_s6, %s2105_s16  }
  0x5e   : > { %399 = sbr.rel (%p2243_p3) target bundleno = 869 (0x365), region = 52  ;;  %s401_s25 = sand.u32 (!%p2243_p3), 1, %s2064_s12  }
  0x5f   : > { %s1259_s24 = sshll.u32 (!%p2243_p3), %s401_s25, 6  ;;  %s402_s11 = scalar_lea.sflag (!%p2243_p3), [#allocation4], %s401_s25 }
  0x60   : > { %s2406_s14 = scalar_lea.vmem (!%p2243_p3), [#allocation3], %s1259_s24 }
  0x63   : > { %2011 = dma.done.wait (%p2351_p7), %s402_s11, 1024  }
  0x64   : > { %2013 = vsyncadd (%p2351_p7), %s402_s11, 4294966272  ;;  %s2666_s9 = sld [smem:[#allocation22_spill]]  ;;  %s411_s3 = sand.u32 1, %s2235_s21  }
  0x65   : > { %s412_s23 = scalar_lea.sflag [#allocation7], %s411_s3 }
  0x6a   : > { %s2414_s30 = sand.u32 1, %s2666_s9  }
  0x6b   : > { %s1260_s0 = sshll.u32 %s2414_s30, 5 }
  0x6c   : > { %s2417_s15 = scalar_lea.vmem [#allocation6], %s1260_s0 }
  0x6d   : > { %2015 = dma.done.wait (%p2277_p12), %s412_s23, 512  }
  0x6e   : > { %2017 = vsyncadd (%p2277_p12), %s412_s23, 4294966784  ;;  %s423_s8 = sand.u32 1, %s2040_s28  }
  0x6f   : > { %s2424_s1 = sshll.u32 %s423_s8, 4 }
  0x70   : > { %s425_s22 = scalar_lea.vmem [#allocation8], %s2424_s1 }
  0x71   : > { %2019 = dma.done.wait (%p2393_p9), %s412_s23, 256  }
  0x72   : > { %2021 = vsyncadd (%p2393_p9), %s412_s23, 4294967040 }
  0x73   : > { %2023 = dma.done.wait (%p69_p1), [#allocation10], 4096  }
  0x74   : > { %2025 = vsyncadd (%p69_p1), [#allocation10], 4294963200 }
  0x75   : > { %2027 = dma.done.wait (%p69_p1), [#allocation13], 3072  }
  0x76   : > { %2029 = vsyncadd (%p69_p1), [#allocation13], 4294964224  ;;  %s2668_s27 = sld [smem:[#allocation25_spill]]  ;;  %s1265_s6 = sshll.u32 %s2414_s30, 6 }
  0x77   : > { %s2669_s7 = sld [smem:[#allocation24_spill]]  ;;  %s2442_s4 = scalar_lea.vmem [#allocation14], %s1265_s6 }
  0x7c   : > { %p488_p3 = scmp.eq.s32.totalorder %s2668_s27, 0 }
  0x7d   : > { %p489_p6 = scmp.eq.s32.totalorder %s2669_s7, 0 }
  0x7f   : > { %p490_p12 = pnand %p489_p6, %p488_p3 }
  0x80   : > { %s2670_s25 = sld [smem:[#allocation38_spill]] (!%p490_p12) }
  0x81   : > { %493 = sbr.rel (%p490_p12) target bundleno = 311 (0x137), region = 80 }
  0x86   : > { %v1434_v0 = vld [vmem:[#allocation9 + $0x38] sm:$0xff]  ;;  %v1433_v1 = vld [vmem:[#allocation9 + $0x30] sm:$0xff]  ;;  %v1432_v2 = vld [vmem:[#allocation9 + $0x28] sm:$0xff] }
  0x87   : > { %594 = vmatpush.bf16.msra.mxu0 %v1434_v0  ;;  %1481 = vmatpush.bf16.msra.mxu1 %v1434_v0  ;;  %v1431_v3 = vld [vmem:[#allocation9 + $0x20] sm:$0xff]  ;;  %v1430_v4 = vld [vmem:[#allocation9 + $0x18] sm:$0xff]  ;;  %v1429_v5 = vld [vmem:[#allocation9 + $0x10] sm:$0xff] }
  0x88   : > { %1482 = vmatpush.bf16.msra.mxu2 %v1434_v0  ;;  %1483 = vmatpush.bf16.msra.mxu3 %v1434_v0  ;;  %v1428_v6 = vld [vmem:[#allocation9 + $0x8] sm:$0xff]  ;;  %v1427_v7 = vld [vmem:[#allocation9] sm:$0xff]  ;;  %v1425_v10 = vld [vmem:[%s2417_s15 + $0x10] sm:$0xff] }
  0x89   : > { %v1423_v8 = vld [vmem:[%s2417_s15] sm:$0xff]  ;;  %v1424_v9 = vld [vmem:[%s2417_s15 + $0x8] sm:$0xff]  ;;  %v1426_v11 = vld [vmem:[%s2417_s15 + $0x18] sm:$0xff] }
  0x8a   : > { %v1736_v12 = vld [vmem:[%s2670_s25] ss:$0 sm:$0xff] }
  0x8b   : > { %595 = vmatpush.bf16.msra.mxu0 %v1433_v1  ;;  %1484 = vmatpush.bf16.msra.mxu1 %v1433_v1 }
  0x8c   : > { %1485 = vmatpush.bf16.msra.mxu2 %v1433_v1  ;;  %1486 = vmatpush.bf16.msra.mxu3 %v1433_v1 }
  0x8f   : > { %596 = vmatpush.bf16.msra.mxu0 %v1432_v2  ;;  %1487 = vmatpush.bf16.msra.mxu1 %v1432_v2 }
  0x90   : > { %1488 = vmatpush.bf16.msra.mxu2 %v1432_v2  ;;  %1489 = vmatpush.bf16.msra.mxu3 %v1432_v2 }
  0x93   : > { %597 = vmatpush.bf16.msra.mxu0 %v1431_v3  ;;  %1490 = vmatpush.bf16.msra.mxu1 %v1431_v3 }
  0x94   : > { %1491 = vmatpush.bf16.msra.mxu2 %v1431_v3  ;;  %1492 = vmatpush.bf16.msra.mxu3 %v1431_v3 }
  0x97   : > { %598 = vmatpush.bf16.msra.mxu0 %v1430_v4  ;;  %1493 = vmatpush.bf16.msra.mxu1 %v1430_v4 }
  0x98   : > { %1494 = vmatpush.bf16.msra.mxu2 %v1430_v4  ;;  %1495 = vmatpush.bf16.msra.mxu3 %v1430_v4 }
  0x9b   : > { %599 = vmatpush.bf16.msra.mxu0 %v1429_v5  ;;  %1496 = vmatpush.bf16.msra.mxu1 %v1429_v5 }
  0x9c   : > { %1497 = vmatpush.bf16.msra.mxu2 %v1429_v5  ;;  %1498 = vmatpush.bf16.msra.mxu3 %v1429_v5 }
  0x9f   : > { %600 = vmatpush.bf16.msra.mxu0 %v1428_v6  ;;  %1499 = vmatpush.bf16.msra.mxu1 %v1428_v6 }
  0xa0   : > { %1500 = vmatpush.bf16.msra.mxu2 %v1428_v6  ;;  %1501 = vmatpush.bf16.msra.mxu3 %v1428_v6 }
  0xa3   : > { %601 = vmatpush.bf16.msra.mxu0 %v1427_v7  ;;  %1502 = vmatpush.bf16.msra.mxu1 %v1427_v7 }
  0xa4   : > { %1503 = vmatpush.bf16.msra.mxu2 %v1427_v7  ;;  %1504 = vmatpush.bf16.msra.mxu3 %v1427_v7 }
  0xa6   : > { %602 = vmatmul.bf16.vlgmr.msra.gmra.mxu0 %v1423_v8  ;;  %607 = vmatmul.bf16.vlgmr.msra.gmra.mxu1 %v1424_v9 }
  0xa7   : > { %612 = vmatmul.bf16.vlgmr.msra.gmra.mxu2 %v1425_v10  ;;  %617 = vmatmul.bf16.vlgmr.msra.gmra.mxu3 %v1426_v11 }
 0x123   : > { %v603_v13 = vpop.f32.mrf.mxu0  ;;  %v608_v14 = vpop.f32.mrf.mxu1 }
 0x124   : > { %v604_v15 = vadd.f32 %v1736_v12, %v603_v13  ;;  %v609_v16 = vadd.f32 %v1736_v12, %v608_v14 }
 0x126   : > { %623 = vst [vmem:[%s2442_s4] sm:$0xff] %v604_v15 }
 0x127   : > { %625 = vst [vmem:[%s2442_s4 + $0x10] sm:$0xff] %v609_v16 }
 0x12a   : > { %v613_v17 = vpop.f32.mrf.mxu2  ;;  %v618_v18 = vpop.f32.mrf.mxu3 }
 0x12b   : > { %v614_v19 = vadd.f32 %v1736_v12, %v613_v17  ;;  %v619_v20 = vadd.f32 %v1736_v12, %v618_v18  ;;  %v605_v21 = vpop.f32.mrf.mxu0  ;;  %v610_v22 = vpop.f32.mrf.mxu1 }
 0x12c   : > { %v606_v23 = vadd.f32 %v1736_v12, %v605_v21  ;;  %v611_v24 = vadd.f32 %v1736_v12, %v610_v22 }
 0x12d   : > { %627 = vst [vmem:[%s2442_s4 + $0x20] sm:$0xff] %v614_v19 }
 0x12e   : > { %629 = vst [vmem:[%s2442_s4 + $0x30] sm:$0xff] %v619_v20 }
 0x12f   : > { %624 = vst [vmem:[%s2442_s4 + $0x8] sm:$0xff] %v606_v23 }
 0x130   : > { %626 = vst [vmem:[%s2442_s4 + $0x18] sm:$0xff] %v611_v24 }
 0x132   : > { %v615_v25 = vpop.f32.mrf.mxu2  ;;  %v620_v26 = vpop.f32.mrf.mxu3 }
 0x133   : > { %v616_v27 = vadd.f32 %v1736_v12, %v615_v25  ;;  %v621_v28 = vadd.f32 %v1736_v12, %v620_v26 }
 0x135   : > { %628 = vst [vmem:[%s2442_s4 + $0x28] sm:$0xff] %v616_v27 }
 0x136   : > { %630 = vst [vmem:[%s2442_s4 + $0x38] sm:$0xff] %v621_v28 }
 0x137 PF: > { %s2671_s24 = sld [smem:[#allocation24_spill]] }
 0x13d   : > { %p1314_p1 = scmp.ne.s32.totalorder %s2671_s24, 0 }
 0x13f   : > { %633 = sbr.rel (%p1314_p1) target bundleno = 333 (0x14d), region = 84 }
 0x144   : > { %v2106_v29 = vmov 0.0  }
 0x145   : > { %634 = vst [vmem:[#allocation2 + $0x30] sm:$0xff] %v2106_v29 }
 0x146   : > { %635 = vst [vmem:[#allocation2] sm:$0xff] %v2106_v29 }
 0x147   : > { %636 = vst [vmem:[#allocation2 + $0x18] sm:$0xff] %v2106_v29 }
 0x148   : > { %637 = vst [vmem:[#allocation2 + $0x10] sm:$0xff] %v2106_v29 }
 0x149   : > { %638 = vst [vmem:[#allocation2 + $0x8] sm:$0xff] %v2106_v29 }
 0x14a   : > { %639 = vst [vmem:[#allocation2 + $0x20] sm:$0xff] %v2106_v29 }
 0x14b   : > { %640 = vst [vmem:[#allocation2 + $0x28] sm:$0xff] %v2106_v29 }
 0x14c   : > { %641 = vst [vmem:[#allocation2 + $0x38] sm:$0xff] %v2106_v29 }
 0x14d PF: > { %v1442_v30 = vld [vmem:[%s2406_s14 + $0x38] sm:$0xff]  ;;  %v1441_v31 = vld [vmem:[%s2406_s14 + $0x30] sm:$0xff]  ;;  %v1440_v32 = vld [vmem:[%s2406_s14 + $0x28] sm:$0xff]  ;;  %s2672_s11 = sld [smem:[#allocation24_spill]] }
 0x14e   : > { %736 = vmatpush.bf16.msra.mxu0 %v1442_v30  ;;  %1505 = vmatpush.bf16.msra.mxu1 %v1442_v30  ;;  %v1439_v33 = vld [vmem:[%s2406_s14 + $0x20] sm:$0xff]  ;;  %v1438_v34 = vld [vmem:[%s2406_s14 + $0x18] sm:$0xff]  ;;  %v1437_v35 = vld [vmem:[%s2406_s14 + $0x10] sm:$0xff] }
 0x14f   : > { %1506 = vmatpush.bf16.msra.mxu2 %v1442_v30  ;;  %1507 = vmatpush.bf16.msra.mxu3 %v1442_v30  ;;  %v642_v36 = vld [vmem:[%s425_s22] sm:$0xff]  ;;  %v643_v37 = vld [vmem:[%s425_s22 + $0x8] sm:$0xff] }
 0x150   : > { %v644_v38 = vunpack.c.0.s8 %v642_v36  ;;  %v645_v39 = vunpack.c.1.s8 %v642_v36  ;;  %v646_v40 = vunpack.c.2.s8 %v642_v36  ;;  %v647_v41 = vunpack.c.3.s8 %v642_v36  ;;  %v1436_v42 = vld [vmem:[%s2406_s14 + $0x8] sm:$0xff]  ;;  %v1435_v51 = vld [vmem:[%s2406_s14] sm:$0xff]  ;;  %v664_v60 = vld [vmem:[#allocation2 + $0x30] sm:$0xff] }
 0x151   : > { %v648_v43 = vunpack.c.0.s8 %v643_v37  ;;  %v649_v44 = vunpack.c.1.s8 %v643_v37  ;;  %v650_v45 = vunpack.c.2.s8 %v643_v37  ;;  %v651_v46 = vunpack.c.3.s8 %v643_v37  ;;  %v666_v61 = vld [vmem:[#allocation2 + $0x18] sm:$0xff]  ;;  %v668_v2 = vld [vmem:[#allocation2 + $0x8] sm:$0xff]  ;;  %v665_v4 = vld [vmem:[#allocation2] sm:$0xff] }
 0x152   : > { %737 = vmatpush.bf16.msra.mxu0 %v1441_v31  ;;  %1508 = vmatpush.bf16.msra.mxu1 %v1441_v31  ;;  %v652_v47 = vcvt.s32.f32 %v644_v38  ;;  %v653_v48 = vcvt.s32.f32 %v645_v39  ;;  %v654_v49 = vcvt.s32.f32 %v646_v40  ;;  %v655_v50 = vcvt.s32.f32 %v647_v41  ;;  %v670_v3 = vld [vmem:[#allocation2 + $0x28] sm:$0xff]  ;;  %v667_v5 = vld [vmem:[#allocation2 + $0x10] sm:$0xff]  ;;  %v669_v14 = vld [vmem:[#allocation2 + $0x20] sm:$0xff] }
 0x153   : > { %1509 = vmatpush.bf16.msra.mxu2 %v1441_v31  ;;  %1510 = vmatpush.bf16.msra.mxu3 %v1441_v31  ;;  %v656_v52 = vcvt.s32.f32 %v648_v43  ;;  %v657_v53 = vcvt.s32.f32 %v649_v44  ;;  %v658_v54 = vcvt.s32.f32 %v650_v45  ;;  %v659_v55 = vcvt.s32.f32 %v651_v46  ;;  %v671_v15 = vld [vmem:[#allocation2 + $0x38] sm:$0xff]  ;;  %p1347_p2 = scmp.ne.s32.totalorder %s2672_s11, 1 }
 0x154   : > { %v660_v56 = vpack.c.bf16 %v653_v48, %v652_v47  ;;  %v661_v57 = vpack.c.bf16 %v655_v50, %v654_v49  ;;  %s2673_s14 = sld [smem:[#allocation25_spill]] (!%p1347_p2) }
 0x155   : > { %v662_v58 = vpack.c.bf16 %v657_v53, %v656_v52  ;;  %v663_v59 = vpack.c.bf16 %v659_v55, %v658_v54  ;;  %s2674_s23 = sld [smem:[#allocation40_spill]] (!%p1347_p2) }
 0x156   : > { %738 = vmatpush.bf16.msra.mxu0 %v1440_v32  ;;  %1511 = vmatpush.bf16.msra.mxu1 %v1440_v32 }
 0x157   : > { %1512 = vmatpush.bf16.msra.mxu2 %v1440_v32  ;;  %1513 = vmatpush.bf16.msra.mxu3 %v1440_v32 }
 0x15a   : > { %739 = vmatpush.bf16.msra.mxu0 %v1439_v33  ;;  %1514 = vmatpush.bf16.msra.mxu1 %v1439_v33  ;;  %s1443_s9 = sshll.u32 (!%p1347_p2), %s2673_s14, 6 }
 0x15b   : > { %1515 = vmatpush.bf16.msra.mxu2 %v1439_v33  ;;  %1516 = vmatpush.bf16.msra.mxu3 %v1439_v33  ;;  %s2474_s26 = scalar_lea.vmem (!%p1347_p2), [#allocation11], %s1443_s9  ;;  %s840_s8 = scalar_lea.vmem (!%p1347_p2), %s2674_s23, %s2673_s14 }
 0x15c   : > { %s2485_s1 = scalar_lea.vmem (!%p1347_p2), [#allocation12], %s1443_s9 }
 0x15e   : > { %740 = vmatpush.bf16.msra.mxu0 %v1438_v34  ;;  %1517 = vmatpush.bf16.msra.mxu1 %v1438_v34 }
 0x15f   : > { %1518 = vmatpush.bf16.msra.mxu2 %v1438_v34  ;;  %1519 = vmatpush.bf16.msra.mxu3 %v1438_v34 }
 0x162   : > { %741 = vmatpush.bf16.msra.mxu0 %v1437_v35  ;;  %1520 = vmatpush.bf16.msra.mxu1 %v1437_v35 }
 0x163   : > { %1521 = vmatpush.bf16.msra.mxu2 %v1437_v35  ;;  %1522 = vmatpush.bf16.msra.mxu3 %v1437_v35 }
 0x166   : > { %742 = vmatpush.bf16.msra.mxu0 %v1436_v42  ;;  %1523 = vmatpush.bf16.msra.mxu1 %v1436_v42 }
 0x167   : > { %1524 = vmatpush.bf16.msra.mxu2 %v1436_v42  ;;  %1525 = vmatpush.bf16.msra.mxu3 %v1436_v42 }
 0x16a   : > { %743 = vmatpush.bf16.msra.mxu0 %v1435_v51  ;;  %1526 = vmatpush.bf16.msra.mxu1 %v1435_v51 }
 0x16b   : > { %1527 = vmatpush.bf16.msra.mxu2 %v1435_v51  ;;  %1528 = vmatpush.bf16.msra.mxu3 %v1435_v51 }
 0x16d   : > { %744 = vmatmul.bf16.vlgmr.msra.gmra.mxu0 %v660_v56  ;;  %749 = vmatmul.bf16.vlgmr.msra.gmra.mxu1 %v661_v57 }
 0x16e   : > { %754 = vmatmul.bf16.vlgmr.msra.gmra.mxu2 %v662_v58  ;;  %759 = vmatmul.bf16.vlgmr.msra.gmra.mxu3 %v663_v59 }
 0x1ea   : > { %v745_v62 = vpop.f32.mrf.mxu0  ;;  %v750_v63 = vpop.f32.mrf.mxu1 }
 0x1eb   : > { %v765_v0 = vadd.f32 %v745_v62, %v664_v60  ;;  %v767_v1 = vadd.f32 %v750_v63, %v666_v61 }
 0x1ed   : > { %773 = vst [vmem:[#allocation2 + $0x30] sm:$0xff] %v765_v0 }
 0x1ee   : > { %775 = vst [vmem:[#allocation2 + $0x18] sm:$0xff] %v767_v1 }
 0x1f1   : > { %v755_v6 = vpop.f32.mrf.mxu2  ;;  %v760_v7 = vpop.f32.mrf.mxu3 }
 0x1f2   : > { %v769_v8 = vadd.f32 %v755_v6, %v668_v2  ;;  %v771_v9 = vadd.f32 %v760_v7, %v670_v3  ;;  %v747_v10 = vpop.f32.mrf.mxu0  ;;  %v752_v11 = vpop.f32.mrf.mxu1 }
 0x1f3   : > { %v766_v12 = vadd.f32 %v747_v10, %v665_v4  ;;  %v768_v13 = vadd.f32 %v752_v11, %v667_v5 }
 0x1f4   : > { %777 = vst [vmem:[#allocation2 + $0x8] sm:$0xff] %v769_v8 }
 0x1f5   : > { %779 = vst [vmem:[#allocation2 + $0x28] sm:$0xff] %v771_v9 }
 0x1f6   : > { %774 = vst [vmem:[#allocation2] sm:$0xff] %v766_v12 }
 0x1f7   : > { %776 = vst [vmem:[#allocation2 + $0x10] sm:$0xff] %v768_v13 }
 0x1f9   : > { %v757_v16 = vpop.f32.mrf.mxu2  ;;  %v762_v17 = vpop.f32.mrf.mxu3  ;;  %784 = sbr.rel (%p1347_p2) target bundleno = 847 (0x34f), region = 88 }
 0x1fa   : > { %v770_v18 = vadd.f32 %v757_v16, %v669_v14  ;;  %v772_v19 = vadd.f32 %v762_v17, %v671_v15 }
 0x1fc   : > { %778 = vst [vmem:[#allocation2 + $0x20] sm:$0xff] %v770_v18 }
 0x1fd   : > { %780 = vst [vmem:[#allocation2 + $0x38] sm:$0xff] %v772_v19 }
 0x1fe   : > { %v1451_v20 = vld [vmem:[%s2474_s26 + $0x38] sm:$0xff]  ;;  %v1450_v21 = vld [vmem:[%s2474_s26 + $0x30] sm:$0xff]  ;;  %v1449_v22 = vld [vmem:[%s2474_s26 + $0x28] sm:$0xff] }
 0x1ff   : > { %893 = vmatpush.bf16.msra.mxu0 %v1451_v20  ;;  %1529 = vmatpush.bf16.msra.mxu2 %v1451_v20  ;;  %v1448_v23 = vld [vmem:[%s2474_s26 + $0x20] sm:$0xff]  ;;  %v1447_v24 = vld [vmem:[%s2474_s26 + $0x18] sm:$0xff]  ;;  %v1446_v26 = vld [vmem:[%s2474_s26 + $0x10] sm:$0xff] }
 0x200   : > { %v1460_v25 = vld [vmem:[%s2485_s1 + $0x38] sm:$0xff]  ;;  %v1463_v27 = vld [vmem:[%s2417_s15] sm:$0xff]   ;;  %v1479_v28 = vld [vmem:[%s2417_s15 + $0x10] sm:$0xff]  }
 0x201   : > { %1008 = vmatpush.bf16.msra.mxu1 %v1460_v25  ;;  %v1459_v29 = vld [vmem:[%s2485_s1 + $0x30] sm:$0xff]  ;;  %1537 = vmatpush.bf16.msra.mxu3 %v1460_v25  ;;  %v1464_v30 = vunpack.c.l.bf16 %v1463_v27  ;;  %v1465_v31 = vunpack.c.h.bf16 %v1463_v27  ;;  %v802_v33 = vld [vmem:[#allocation2] sm:$0xff]  ;;  %v1472_v34 = vunpack.c.l.bf16 %v1479_v28  ;;  %v1473_v35 = vunpack.c.h.bf16 %v1479_v28  ;;  %v1445_v36 = vld [vmem:[%s2474_s26 + $0x8] sm:$0xff] }
 0x202   : > { %v801_v32 = vld [vmem:[#allocation2 + $0x30] sm:$0xff]  ;;  %v805_v37 = vld [vmem:[#allocation2 + $0x8] sm:$0xff]  ;;  %v1444_v44 = vld [vmem:[%s2474_s26] sm:$0xff] }
 0x203   : > { %894 = vmatpush.bf16.msra.mxu0 %v1450_v21  ;;  %1530 = vmatpush.bf16.msra.mxu2 %v1450_v21  ;;  %v806_v38 = vld [vmem:[#allocation2 + $0x20] sm:$0xff]  ;;  %v1458_v39 = vld [vmem:[%s2485_s1 + $0x28] sm:$0xff]  ;;  %v809_v40 = vadd.f32 %v1464_v30, %v801_v32  ;;  %v810_v41 = vadd.f32 %v1465_v31, %v802_v33  ;;  %v813_v42 = vadd.f32 %v1472_v34, %v805_v37  ;;  %v1480_v49 = vld [vmem:[%s2417_s15 + $0x18] sm:$0xff]  }
 0x204   : > { %v814_v43 = vadd.f32 %v1473_v35, %v806_v38  ;;  %v1457_v45 = vld [vmem:[%s2485_s1 + $0x20] sm:$0xff]  ;;  %v1478_v48 = vld [vmem:[%s2417_s15 + $0x8] sm:$0xff]   ;;  %v803_v52 = vld [vmem:[#allocation2 + $0x18] sm:$0xff]  ;;  %v1476_v53 = vunpack.c.l.bf16 %v1480_v49  ;;  %v1477_v54 = vunpack.c.h.bf16 %v1480_v49 }
 0x205   : > { %1009 = vmatpush.bf16.msra.mxu1 %v1459_v29  ;;  %1538 = vmatpush.bf16.msra.mxu3 %v1459_v29  ;;  %v817_v46 = vpack.c.bf16 %v810_v41, %v809_v40  ;;  %v1468_v50 = vunpack.c.l.bf16 %v1478_v48  ;;  %v1469_v51 = vunpack.c.h.bf16 %v1478_v48  ;;  %v804_v55 = vld [vmem:[#allocation2 + $0x10] sm:$0xff]  ;;  %v807_v56 = vld [vmem:[#allocation2 + $0x28] sm:$0xff]  ;;  %v808_v57 = vld [vmem:[#allocation2 + $0x38] sm:$0xff] }
 0x206   : > { %v819_v47 = vpack.c.bf16 %v814_v43, %v813_v42  ;;  %v815_v60 = vadd.f32 %v1476_v53, %v807_v56  ;;  %v816_v61 = vadd.f32 %v1477_v54, %v808_v57  ;;  %v1456_v0 = vld [vmem:[%s2485_s1 + $0x18] sm:$0xff]  ;;  %v1455_v1 = vld [vmem:[%s2485_s1 + $0x10] sm:$0xff]  ;;  %v1454_v2 = vld [vmem:[%s2485_s1 + $0x8] sm:$0xff] }
 0x207   : > { %895 = vmatpush.bf16.msra.mxu0 %v1449_v22  ;;  %1531 = vmatpush.bf16.msra.mxu2 %v1449_v22  ;;  %v811_v58 = vadd.f32 %v1468_v50, %v803_v52  ;;  %v812_v59 = vadd.f32 %v1469_v51, %v804_v55  ;;  %v1453_v3 = vld [vmem:[%s2485_s1] sm:$0xff]  ;;  %v936_v42 = vld [vmem:[%s2442_s4 + $0x10] sm:$0xff]  ;;  %v937_v48 = vld [vmem:[%s2442_s4 + $0x18] sm:$0xff] }
 0x208   : > { %v820_v63 = vpack.c.bf16 %v816_v61, %v815_v60  ;;  %v1737_v5 = vld [vmem:[%s840_s8] ss:$0 sm:$0xff]  ;;  %v940_v51 = vld [vmem:[%s2442_s4 + $0x30] sm:$0xff]  ;;  %v941_v54 = vld [vmem:[%s2442_s4 + $0x38] sm:$0xff] }
 0x209   : > { %1010 = vmatpush.bf16.msra.mxu1 %v1458_v39  ;;  %1539 = vmatpush.bf16.msra.mxu3 %v1458_v39  ;;  %v818_v62 = vpack.c.bf16 %v812_v59, %v811_v58  ;;  %v934_v33 = vld [vmem:[%s2442_s4] sm:$0xff] }
 0x20a   : > { %v938_v39 = vld [vmem:[%s2442_s4 + $0x20] sm:$0xff] }
 0x20b   : > { %896 = vmatpush.bf16.msra.mxu0 %v1448_v23  ;;  %1532 = vmatpush.bf16.msra.mxu2 %v1448_v23 }
 0x20d   : > { %1011 = vmatpush.bf16.msra.mxu1 %v1457_v45  ;;  %1540 = vmatpush.bf16.msra.mxu3 %v1457_v45  ;;  %v939_v45 = vld [vmem:[%s2442_s4 + $0x28] sm:$0xff] }
 0x20f   : > { %897 = vmatpush.bf16.msra.mxu0 %v1447_v24  ;;  %1533 = vmatpush.bf16.msra.mxu2 %v1447_v24 }
 0x211   : > { %1012 = vmatpush.bf16.msra.mxu1 %v1456_v0  ;;  %1541 = vmatpush.bf16.msra.mxu3 %v1456_v0 }
 0x213   : > { %898 = vmatpush.bf16.msra.mxu0 %v1446_v26  ;;  %1534 = vmatpush.bf16.msra.mxu2 %v1446_v26 }
 0x215   : > { %1013 = vmatpush.bf16.msra.mxu1 %v1455_v1  ;;  %1542 = vmatpush.bf16.msra.mxu3 %v1455_v1 }
 0x217   : > { %899 = vmatpush.bf16.msra.mxu0 %v1445_v36  ;;  %1535 = vmatpush.bf16.msra.mxu2 %v1445_v36  ;;  %v935_v36 = vld [vmem:[%s2442_s4 + $0x8] sm:$0xff] }
 0x219   : > { %1014 = vmatpush.bf16.msra.mxu1 %v1454_v2  ;;  %1543 = vmatpush.bf16.msra.mxu3 %v1454_v2 }
 0x21b   : > { %900 = vmatpush.bf16.msra.mxu0 %v1444_v44  ;;  %1536 = vmatpush.bf16.msra.mxu2 %v1444_v44 }
 0x21d   : > { %1015 = vmatpush.bf16.msra.mxu1 %v1453_v3  ;;  %1544 = vmatpush.bf16.msra.mxu3 %v1453_v3 }
 0x21e   : > { %901 = vmatmul.bf16.vlgmr.msra.gmra.mxu0 %v817_v46  ;;  %911 = vmatmul.bf16.vlgmr.msra.gmra.mxu2 %v819_v47 }
 0x22e   : > { %906 = vmatmul.bf16.gmra.mxu0 %v818_v62  ;;  %916 = vmatmul.bf16.gmra.mxu2 %v820_v63 }
 0x29b   : > { %v902_v4 = vpop.f32.mrf.mxu0 }
 0x29c   : > { %v903_v6 = vadd.f32 %v1737_v5, %v902_v4 }
 0x29e   : > { %v922_v9 = vmax.f32 %v903_v6, 0.0 }
 0x2a1   : > { %v912_v7 = vpop.f32.mrf.mxu2 }
 0x2a2   : > { %v913_v12 = vadd.f32 %v1737_v5, %v912_v7 }
 0x2a3   : > { %v904_v8 = vpop.f32.mrf.mxu0 }
 0x2a4   : > { %v905_v10 = vadd.f32 %v1737_v5, %v904_v8  ;;  %v926_v17 = vmax.f32 %v913_v12, 0.0 }
 0x2a6   : > { %v923_v11 = vmax.f32 %v905_v10, 0.0 }
 0x2a8   : > { %v930_v13 = vpack.c.bf16 %v923_v11, %v922_v9 }
 0x2a9   : > { %v914_v14 = vpop.f32.mrf.mxu2 }
 0x2aa   : > { %v915_v15 = vadd.f32 %v1737_v5, %v914_v14  ;;  %1016 = vmatmul.bf16.vlgmr.msra.gmra.mxu1 %v930_v13 }
 0x2ab   : > { %v907_v16 = vpop.f32.mrf.mxu0 }
 0x2ac   : > { %v927_v18 = vmax.f32 %v915_v15, 0.0  ;;  %v908_v20 = vadd.f32 %v1737_v5, %v907_v16 }
 0x2ae   : > { %v932_v19 = vpack.c.bf16 %v927_v18, %v926_v17  ;;  %v924_v23 = vmax.f32 %v908_v20, 0.0 }
 0x2b0   : > { %1026 = vmatmul.bf16.vlgmr.msra.gmra.mxu3 %v932_v19 }
 0x2b1   : > { %v917_v21 = vpop.f32.mrf.mxu2 }
 0x2b2   : > { %v918_v26 = vadd.f32 %v1737_v5, %v917_v21 }
 0x2b3   : > { %v909_v22 = vpop.f32.mrf.mxu0 }
 0x2b4   : > { %v910_v24 = vadd.f32 %v1737_v5, %v909_v22  ;;  %v928_v30 = vmax.f32 %v918_v26, 0.0 }
 0x2b6   : > { %v925_v25 = vmax.f32 %v910_v24, 0.0 }
 0x2b8   : > { %v931_v27 = vpack.c.bf16 %v925_v25, %v924_v23 }
 0x2b9   : > { %v919_v28 = vpop.f32.mrf.mxu2 }
 0x2ba   : > { %v920_v29 = vadd.f32 %v1737_v5, %v919_v28  ;;  %1021 = vmatmul.bf16.gmra.mxu1 %v931_v27 }
 0x2bc   : > { %v929_v31 = vmax.f32 %v920_v29, 0.0 }
 0x2be   : > { %v933_v32 = vpack.c.bf16 %v929_v31, %v928_v30 }
 0x2c0   : > { %1031 = vmatmul.bf16.gmra.mxu3 %v933_v32 }
 0x327   : > { %v1017_v34 = vpop.f32.mrf.mxu1 }
 0x328   : > { %v1037_v35 = vadd.f32 %v1017_v34, %v934_v33 }
 0x32a   : > { %1045 = vst [vmem:[%s2442_s4] sm:$0xff] %v1037_v35 }
 0x32f   : > { %v1019_v37 = vpop.f32.mrf.mxu1 }
 0x330   : > { %v1038_v38 = vadd.f32 %v1019_v37, %v935_v36 }
 0x332   : > { %1046 = vst [vmem:[%s2442_s4 + $0x8] sm:$0xff] %v1038_v38 }
 0x333   : > { %v1027_v40 = vpop.f32.mrf.mxu3 }
 0x334   : > { %v1041_v41 = vadd.f32 %v1027_v40, %v938_v39 }
 0x336   : > { %1049 = vst [vmem:[%s2442_s4 + $0x20] sm:$0xff] %v1041_v41 }
 0x337   : > { %v1022_v43 = vpop.f32.mrf.mxu1 }
 0x338   : > { %v1039_v44 = vadd.f32 %v1022_v43, %v936_v42 }
 0x33a   : > { %1047 = vst [vmem:[%s2442_s4 + $0x10] sm:$0xff] %v1039_v44 }
 0x33b   : > { %v1029_v46 = vpop.f32.mrf.mxu3 }
 0x33c   : > { %v1042_v47 = vadd.f32 %v1029_v46, %v939_v45 }
 0x33e   : > { %1050 = vst [vmem:[%s2442_s4 + $0x28] sm:$0xff] %v1042_v47 }
 0x33f   : > { %v1024_v49 = vpop.f32.mrf.mxu1 }
 0x340   : > { %v1040_v50 = vadd.f32 %v1024_v49, %v937_v48 }
 0x342   : > { %1048 = vst [vmem:[%s2442_s4 + $0x18] sm:$0xff] %v1040_v50 }
 0x343   : > { %v1032_v52 = vpop.f32.mrf.mxu3 }
 0x344   : > { %v1043_v53 = vadd.f32 %v1032_v52, %v940_v51 }
 0x346   : > { %1051 = vst [vmem:[%s2442_s4 + $0x30] sm:$0xff] %v1043_v53 }
 0x34b   : > { %v1034_v55 = vpop.f32.mrf.mxu3 }
 0x34c   : > { %v1044_v56 = vadd.f32 %v1034_v55, %v941_v54 }
 0x34e   : > { %1052 = vst [vmem:[%s2442_s4 + $0x38] sm:$0xff] %v1044_v56 }
 0x34f PF: > { %s2675_s27 = sld [smem:[#allocation26_spill]]  ;;  %s1066_s11 = sshll.u32 %s2442_s4, 4  ;;  %s1067_s11 = int_to_ptr.vmem [resolvable:$true] %s1066_s11 }
 0x350   : > { %s2677_s25 = sld [smem:[#allocation42_spill]]  ;;  %s1054_s9 = scalar_lea.sflag [#allocation5], %s2414_s30 }
 0x355   : > { %s1461_s6 = sshll.u32 %s2675_s27, 6 }
 0x356   : > { %s1065_s24 = scalar_lea.hbm %s2677_s25, %s1461_s6  ;;  %s1938_s1 = scalar_lea.hbm %s2677_s25, 256 }
 0x357   : > { %s1068_s14 = sshll.u32 %s1065_s24, 4  ;;  %s1069_s14 = int_to_ptr.hbm [resolvable:$true] %s1068_s14 }
 0x358   : > { %s1932_s26 = sshra.s32 %s1069_s14, 4  ;;  %s1933_s26 = int_to_ptr.hbm [resolvable:$true] %s1932_s26 }
 0x359   : > { %s1934_s3 = scalar_lea.hbm %s1933_s26, 64  ;;  %p1939_p4 = scmp.lt.s32.totalorder %s1933_s26, %s2677_s25 }
 0x35a   : > { %p1935_p7 = scmp.ne.s32.totalorder %s1933_s26, %s1934_s3  ;;  %p1940_p8 = scmp.lt.s32.totalorder %s1938_s1, %s1934_s3 }
 0x35c   : > { %p1936_p10 = pnand %p1935_p7, %p2281_p13  ;;  %p1941_p9 = por %p1940_p8, %p1939_p4 }
 0x35e   : > { %p1937_p11 = pneg %p1936_p10 }
 0x360   : > { %p1942_p5 = pnand %p1941_p9, %p1937_p11 }
 0x362   : > { %1945 = shalt.err (!%p1942_p5)
}
 0x363   : > { %s2107_s30 = smov 128   ;;  %s2108_s4 = smov 8  }
 0x364   : > { %1563 = dma.vmem_to_hbm [thread:$0]  (%p2281_p13), %s1067_s11, 1024, %s1069_s14, %s1054_s9, %s2107_s30, %s2107_s30, %s2108_s4  }
 0x365 PF: > { %s2678_s27 = sld [smem:[#allocation21_spill]]  ;;  %p1596_p3 = scmp.ge.s32.totalorder %s2096_s20, 2 }
 0x367   : > { %p1586_p6 = pnand %p1596_p3, %p2285_p0 }
 0x369   : > { %p1587_p12 = pneg %p1586_p6 }
 0x36b   : > { %s1083_s21 = sand.u32 1, %s2678_s27  }
 0x36c   : > { %s1084_s16 = scalar_lea.sflag [#allocation5], %s1083_s21 }
 0x36d   : > { %2031 = dma.done.wait (%p1587_p12), %s1084_s16, 1024  }
 0x36e   : > { %2033 = vsyncadd (%p1587_p12), %s1084_s16, 4294966272  ;;  %s29_s20 = sadd.s32 1, %s2096_s20   ;;  %s2681_s30 = sld [smem:[#allocation22_spill]] }
 0x36f   : > { %p2544_p1 = scmp.ge.s32.totalorder %s29_s20, 26   ;;  %s2682_s7 = sld [smem:[#allocation23_spill]] }
 0x370   : > { %s2683_s14 = sld [smem:[#allocation33_spill]]  ;;  %s2687_s27 = smov %s2040_s28 }
 0x371   : > { %s2684_s26 = sld [smem:[#allocation31_spill]]  ;;  %s2688_s28 = smov %s2044_s29 }
 0x372   : > { %s2685_s3 = sld [smem:[#allocation32_spill]]  ;;  %s2689_s29 = smov %s2381_s5 }
 0x373   : > { %s2686_s0 = sld [smem:[#allocation34_spill]]  ;;  %s2690_s9 = smov %s2056_s10 }
 0x374   : > { %s2691_s10 = smov %s2368_s13  ;;  %s2692_s11 = smov %s2064_s12 }
 0x375   : > { %s2693_s12 = smov %s2682_s7  ;;  %s2696_s15 = smov %s2088_s18 }
 0x376   : > { %s2694_s13 = smov %s2683_s14  ;;  %s2695_s14 = smov %s2084_s17 }
 0x377   : > { %s2697_s16 = smov %s2092_s19  ;;  %s2698_s17 = smov %s2684_s26 }
 0x378   : > { %s2699_s18 = smov %s2685_s3  ;;  %28 = sbr.rel (!%p2544_p1) target bundleno = 24 (0x18), region = 148 }
 0x379   : > { %s2700_s19 = smov %s2686_s0 }
 0x37d   :  { %1090 = vsyncpa [#allocation4], 1 }
 0x37e   :  { %1092 = vsyncpa [#allocation4 + $0x1], 1 }
 0x37f   :  { %1093 = vsyncpa [#allocation7], 1 }
 0x380   :  { %1095 = vsyncpa [#allocation7 + $0x1], 1 }
 0x381   :  { %1096 = vsyncpa [#allocation10], 1 }
 0x382   :  { %1097 = vsyncpa [#allocation13], 1 }
 0x383   :  { %1098 = vsyncpa [#allocation5], 1 }
 0x384   :  { %1100 = vsyncpa [#allocation5 + $0x1], 1 }

// kernel: tpu_custom_call.1
= control target key start
LH: loop header
LB: loop body
LE: loop exit
PB: predicated region body
PF: predicated region fallthrough
CT: control target
= control target key end

     0   :  { %s2597_s0 = inlined_call_operand.hbm [shape: bf16[256,128], index: 0, kind: input, shape index: {}]   ;;  %s2598_s1 = inlined_call_operand.hbm [shape: bf16[256,128], index: 1, kind: input, shape index: {}]   ;;  %s2599_s2 = inlined_call_operand.hbm [shape: s8[3,256,256], index: 2, kind: input, shape index: {}]   ;;  %s2600_s3 = inlined_call_operand.hbm [shape: bf16[128,128], index: 3, kind: input, shape index: {}]   ;;  %s2601_s4 = inlined_call_operand.vmem [shape: f32[1,128], index: 4, kind: input, shape index: {}]   ;;  %s2602_s5 = inlined_call_operand.hbm [shape: bf16[3,128,128], index: 5, kind: input, shape index: {}]   ;;  %s2603_s6 = inlined_call_operand.vmem [shape: f32[3,1,128], index: 6, kind: input, shape index: {}]   ;;  %s2604_s7 = inlined_call_operand.hbm [shape: bf16[3,128,128], index: 7, kind: input, shape index: {}]   ;;  %s2605_s8 = inlined_call_operand.hbm [shape: f32[256,128], index: 8, kind: output, shape index: {}]  }
   0x1   :  { %2625 = sst [smem:[#allocation35_spill]] %s2597_s0 }
   0x2   :  { %2626 = sst [smem:[#allocation36_spill]] %s2598_s1 }
   0x3   :  { %2627 = sst [smem:[#allocation37_spill]] %s2600_s3 }
   0x4   :  { %2628 = sst [smem:[#allocation38_spill]] %s2601_s4 }
   0x5   :  { %2629 = sst [smem:[#allocation39_spill]] %s2602_s5 }
   0x6   :  { %2630 = sst [smem:[#allocation40_spill]] %s2603_s6 }
   0x7   :  { %2631 = sst [smem:[#allocation41_spill]] %s2604_s7 }
   0x8   :  { %2632 = sst [smem:[#allocation42_spill]] %s2605_s8 }
   0x9   :  { %13 = vsyncpa [#allocation4], 0 }
   0xa   :  { %15 = vsyncpa [#allocation4 + $0x1], 0 }
   0xb   :  { %16 = vsyncpa [#allocation7], 0 }
   0xc   :  { %18 = vsyncpa [#allocation7 + $0x1], 0 }
   0xd   :  { %19 = vsyncpa [#allocation10], 0 }
   0xe   :  { %20 = vsyncpa [#allocation13], 0 }
   0xf   :  { %21 = vsyncpa [#allocation5], 0 }
  0x10   :  { %23 = vsyncpa [#allocation5 + $0x1], 0  ;;  %s2154_s27 = smov 0   ;;  %s2156_s28 = smov 0  }
  0x11   :  { %s2158_s29 = smov 0   ;;  %s2160_s30 = smov 0  }
  0x12   :  { %s2162_s9 = smov 0   ;;  %s2164_s10 = smov 0  }
  0x13   :  { %s2166_s11 = smov 0   ;;  %s2168_s12 = smov 0  }
  0x14   :  { %s2170_s13 = smov 0   ;;  %s2172_s14 = smov 0  }
  0x15   :  { %s2174_s15 = smov 0   ;;  %s2176_s16 = smov 0  }
  0x16   :  { %s2178_s17 = smov 0   ;;  %s2180_s18 = smov 0  }
  0x17   :  { %s2182_s19 = smov 0   ;;  %s2184_s20 = smov 0  }
  0x18 LB: > { %2633 = sst [smem:[#allocation21_spill]] %s2048_s30  ;;  %s2235_s21 = sadd.s32 4294967295, %s2096_s20   ;;  %s2096_s20 = sphi %s2184_s20, %s29_s20   ;;  %s2092_s19 = sphi %s2182_s19, %s2700_s19   ;;  %s2088_s18 = sphi %s2180_s18, %s2699_s18   ;;  %s2084_s17 = sphi %s2178_s17, %s2698_s17   ;;  %s2080_s16 = sphi %s2176_s16, %s2697_s16   ;;  %s2076_s15 = sphi %s2174_s15, %s2696_s15   ;;  %s2072_s14 = sphi %s2172_s14, %s2695_s14   ;;  %s2068_s13 = sphi %s2170_s13, %s2694_s13   ;;  %s2064_s12 = sphi %s2168_s12, %s2693_s12   ;;  %s2060_s11 = sphi %s2166_s11, %s2692_s11   ;;  %s2056_s10 = sphi %s2164_s10, %s2691_s10   ;;  %s2052_s9 = sphi %s2162_s9, %s2690_s9   ;;  %s2048_s30 = sphi %s2160_s30, %s2681_s30   ;;  %s2044_s29 = sphi %s2158_s29, %s2689_s29   ;;  %s2040_s28 = sphi %s2156_s28, %s2688_s28   ;;  %s2036_s27 = sphi %s2154_s27, %s2687_s27  }
  0x19   : > { %2634 = sst [smem:[#allocation22_spill]] %s2052_s9  ;;  %p1242_p0 = scmp.ge.s32.totalorder %s2096_s20, 1 }
  0x1a   : > { %2635 = sst [smem:[#allocation23_spill]] %s2068_s13  ;;  %p69_p1 = scmp.eq.s32.totalorder %s2235_s21, 0 }
  0x1b   : > { %2636 = sst [smem:[#allocation24_spill]] %s2072_s14  ;;  %p266_p2 = scmp.lt.s32.totalorder %s2096_s20, 25 }
  0x1c   : > { %2637 = sst [smem:[#allocation25_spill]] %s2076_s15  ;;  %s2098_s26 = smov [#allocation9]  }
  0x1d   : > { %2638 = sst [smem:[#allocation26_spill]] %s2080_s16  ;;  %p2243_p3 = pnand %p1242_p0, %p266_p2 }
  0x1e   : > { %s2639_s3 = sld [smem:[#allocation37_spill]]  ;;  %s279_s8 = sshll.u32 %s2098_s26, 4  ;;  %s280_s8 = int_to_ptr.vmem [resolvable:$true] %s279_s8 }
  0x1f   : > { %s2640_s25 = scalar_select %p2243_p3, 1, 0 }
  0x20   : > { %p1565_p4 = pneg %p2243_p3  ;;  %s2608_s23 = smov 64  }
  0x21   : > { %2641 = sst [smem:[#allocation27_spill]] %s2640_s25  ;;  %s1241_s16 = sadd.s32 4294967294, %s2096_s20  }
  0x22   : > { %p2251_p5 = pnand %p1565_p4, %p69_p1  ;;  %p63_p6 = scmp.eq.s32.totalorder %s2096_s20, 0 }
  0x23   : > { %p88_p7 = scmp.ne.s32.totalorder %s2056_s10, %s2052_s9  ;;  %p94_p8 = scmp.ne.s32.totalorder %s2052_s9, %s2048_s30 }
  0x24   : > { %s277_s24 = sshll.u32 %s2639_s3, 4  ;;  %s2610_s3 = smov 4   ;;  %s278_s24 = int_to_ptr.hbm [resolvable:$true] %s277_s24 }
  0x25   : > { %1568 = dma.hbm_to_vmem [thread:$0]  (!%p2251_p5), %s278_s24, 1024, %s280_s8, [#allocation10], %s2608_s23, %s2608_s23, %s2610_s3  }
  0x26   : > { %p253_p9 = scmp.eq.s32.totalorder %s2235_s21, 23  ;;  %p2271_p10 = por %p88_p7, %p63_p6 }
  0x27   : > { %p259_p11 = scmp.eq.s32.totalorder %s1241_s16, 23  ;;  %p2277_p12 = por %p94_p8, %p69_p1 }
  0x28   : > { %p2281_p13 = por %p253_p9, %p88_p7  ;;  %p1592_p2 = scmp.lt.s32.totalorder %s2096_s20, 24 }
  0x29   : > { %s2644_s14 = scalar_select %p2277_p12, 1, 0 }
  0x2a   : > { %s2646_s8 = scalar_select %p2281_p13, 1, 0 }
  0x2b   : > { %2645 = sst [smem:[#allocation28_spill]] %s2644_s14  ;;  %p2285_p0 = por %p259_p11, %p94_p8 }
  0x2c   : > { %2647 = sst [smem:[#allocation29_spill]] %s2646_s8  ;;  %s349_s6 = sand.u32 1, %s2096_s20  }
  0x2d   : > { %s2648_s24 = scalar_select %p2285_p0, 1, 0 }
  0x2e   : > { %s351_s26 = sand.u32 1, %s2056_s10   ;;  %s1421_s3 = sshll.u32 %s2092_s19, 5 }
  0x2f   : > { %2649 = sst [smem:[#allocation30_spill]] %s2648_s24  ;;  %s1250_s23 = sshll.u32 %s351_s26, 5 }
  0x30   : > { %s2650_s1 = sld [smem:[#allocation36_spill]]  ;;  %s353_s9 = scalar_lea.vmem [#allocation6], %s1250_s23 }
  0x31   : > { %s361_s14 = sshll.u32 %s353_s9, 4  ;;  %p1579_p4 = pnand %p1592_p2, %p2271_p10  ;;  %s362_s14 = int_to_ptr.vmem [resolvable:$true] %s361_s14 }
  0x32   : > { %s2651_s5 = sld [smem:[#allocation39_spill]]  ;;  %s2303_s30 = scalar_lea.sflag [#allocation7], %s349_s6 }
  0x33   : > { %s2653_s23 = smov 64   ;;  %s2101_s4 = smov [#allocation11]  }
  0x34   : > { %s296_s9 = sshll.u32 %s2101_s4, 4  ;;  %s2654_s7 = sld [smem:[#allocation41_spill]]  ;;  %s297_s9 = int_to_ptr.vmem [resolvable:$true] %s296_s9 }
  0x35   : > { %s2102_s6 = smov [#allocation12]   ;;  %s44_s24 = sadd.s32 1, %s2088_s18 }
  0x36   : > { %s358_s15 = scalar_lea.hbm %s2650_s1, %s1421_s3  ;;  %s2652_s3 = smov 4  }
  0x37   : > { %s359_s25 = sshll.u32 %s358_s15, 4  ;;  %p62_p8 = scmp.ne.s32.totalorder %s2068_s13, %s2064_s12  ;;  %s360_s25 = int_to_ptr.hbm [resolvable:$true] %s359_s25 }
  0x38   : > { %s294_s26 = sshll.u32 %s2651_s5, 4  ;;  %p68_p11 = scmp.ne.s32.totalorder %s2064_s12, %s2060_s11  ;;  %s295_s26 = int_to_ptr.hbm [resolvable:$true] %s294_s26 }
  0x39   : > { %1581 = dma.hbm_to_vmem [thread:$0]  (!%p1579_p4), %s360_s25, 512, %s362_s14, %s2303_s30, %s2653_s23, %s2653_s23, %s2652_s3  }
  0x3a   : > { %s311_s8 = sshll.u32 %s2654_s7, 4  ;;  %s313_s14 = sshll.u32 %s2102_s6, 4  ;;  %s312_s8 = int_to_ptr.hbm [resolvable:$true] %s311_s8  ;;  %s314_s14 = int_to_ptr.vmem [resolvable:$true] %s313_s14 }
  0x3b   : > { %1571 = dma.hbm_to_vmem [thread:$0]  (!%p2251_p5), %s295_s26, 3072, %s297_s9, [#allocation10], %s2653_s23, %s2653_s23, %s2652_s3  }
  0x3c   : > { %1574 = dma.hbm_to_vmem [thread:$0]  (!%p2251_p5), %s312_s8, 3072, %s314_s14, [#allocation13], %s2653_s23, %s2653_s23, %s2652_s3  }
  0x3d   : > { %s41_s25 = sadd.s32 1, %s2084_s17  ;;  %s55_s26 = sadd.s32 1, %s2068_s13 }
  0x3e   : > { %p42_p7 = scmp.ge.s32.totalorder %s41_s25, 2  ;;  %p2334_p9 = por %p63_p6, %p62_p8 }
  0x3f   : > { %s327_s9 = sand.u32 1, %s2068_s13   ;;  %s2658_s15 = sadd.s32 1, %s2092_s19 }
  0x40   : > { %s2702_s25 = smov (%p42_p7, %s41_s25), 0  ;;  %s2704_s24 = smov (!%p42_p7, %s44_s24), %s2088_s18 }
  0x41   : > { %2655 = sst [smem:[#allocation31_spill]] %s2702_s25  ;;  %s52_s22 = ssub.s32 %s2084_s17, %s2702_s25 }
  0x42   : > { %p46_p5 = scmp.ge.s32.totalorder %s2704_s24, 3  ;;  %p53_p10 = scmp.eq.s32.totalorder %s52_s22, 0 }
  0x43   : > { %p2351_p7 = por %p69_p1, %p68_p11  ;;  %s1247_s11 = sshll.u32 %s327_s9, 6 }
  0x44   : > { %s2706_s24 = smov (%p46_p5, %s2704_s24), 0  ;;  %s2708_s15 = smov (!%p46_p5, %s2658_s15), %s2092_s19 }
  0x45   : > { %2657 = sst [smem:[#allocation32_spill]] %s2706_s24  ;;  %p50_p4 = scmp.ge.s32.totalorder %s2708_s15, 4 }
  0x46   : > { %s2347_s16 = scalar_select %p53_p10, %s2068_s13, %s55_s26  }
  0x47   : > { %s104_s6 = ssub.s32 %s2088_s18, %s2706_s24  ;;  %s2710_s15 = smov (%p50_p4, %s2708_s15), 0 }
  0x48   : > { %2659 = sst [smem:[#allocation33_spill]] %s2347_s16  ;;  %s1420_s14 = sshll.u32 %s2084_s17, 6 }
  0x49   : > { %2661 = sst [smem:[#allocation34_spill]] %s2710_s15  ;;  %s78_s1 = ssub.s32 %s2092_s19, %s2710_s15 }
  0x4a   : > { %p79_p8 = scmp.eq.s32.totalorder %s78_s1, 0  ;;  %s106_s26 = sor.u32 %s104_s6, %s78_s1 }
  0x4b   : > { %s108_s5 = sor.u32 %s106_s26, %s52_s22  ;;  %s2662_s0 = sld [smem:[#allocation35_spill]] }
  0x4c   : > { %s2663_s16 = sadd.s32 1, %s2056_s10  ;;  %p109_p5 = scmp.eq.s32.totalorder %s108_s5, 0 }
  0x4d   : > { %s2368_s13 = scalar_select %p79_p8, %s2056_s10, %s2663_s16  }
  0x4e   : > { %s331_s1 = scalar_lea.vmem [#allocation3], %s1247_s11  ;;  %p1576_p10 = pnand %p1592_p2, %p2334_p9 }
  0x4f   : > { %s339_s22 = sshll.u32 %s331_s1, 4  ;;  %s1422_s7 = sshll.u32 %s2092_s19, 2  ;;  %s340_s22 = int_to_ptr.vmem [resolvable:$true] %s339_s22 }
  0x50   : > { %s380_s25 = sadd.s32 %s2084_s17, %s1422_s7  ;;  %s328_s6 = scalar_lea.sflag [#allocation4], %s327_s9 }
  0x51   : > { %s336_s24 = scalar_lea.hbm %s2662_s0, %s1420_s14  ;;  %s111_s16 = sadd.s32 1, %s2044_s29 }
  0x52   : > { %s337_s15 = sshll.u32 %s336_s24, 4  ;;  %p118_p11 = scmp.ne.s32.totalorder %s2044_s29, %s2040_s28  ;;  %s338_s15 = int_to_ptr.hbm [resolvable:$true] %s337_s15 }
  0x53   : > { %1578 = dma.hbm_to_vmem [thread:$0]  (!%p1576_p10), %s338_s15, 1024, %s340_s22, %s328_s6, %s2653_s23, %s2653_s23, %s2652_s3  }
  0x54   : > { %s2381_s5 = scalar_select %p109_p5, %s2044_s29, %s111_s16  }
  0x55   : > { %p124_p4 = scmp.ne.s32.totalorder %s2040_s28, %s2036_s27  ;;  %s373_s24 = sand.u32 1, %s2044_s29  }
  0x56   : > { %s1256_s11 = sshll.u32 %s2088_s18, 4  ;;  %p120_p8 = por %p118_p11, %p63_p6 }
  0x57   : > { %p2393_p9 = por %p124_p4, %p69_p1  ;;  %s1253_s9 = sshll.u32 %s373_s24, 4 }
  0x58   : > { %s382_s14 = sadd.s32 %s1256_s11, %s380_s25  ;;  %s375_s1 = scalar_lea.vmem [#allocation8], %s1253_s9 }
  0x59   : > { %s1257_s26 = sshll.u32 %s382_s14, 3  ;;  %s387_s22 = sshll.u32 %s375_s1, 4  ;;  %s388_s22 = int_to_ptr.vmem [resolvable:$true] %s387_s22 }
  0x5a   : > { %s384_s15 = scalar_lea.hbm %s2599_s2, %s1257_s26  ;;  %p1582_p5 = pnand %p1592_p2, %p120_p8 }
  0x5b   : > { %s385_s27 = sshll.u32 %s384_s15, 4  ;;  %s2103_s7 = smov 256   ;;  %s386_s27 = int_to_ptr.hbm [resolvable:$true] %s385_s27 }
  0x5c   : > { %s2104_s6 = smov 128   ;;  %s2105_s16 = smov 8  }
  0x5d   : > { %1584 = dma.hbm_to_vmem [thread:$0]  (!%p1582_p5), %s386_s27, 256, %s388_s22, %s2303_s30, %s2103_s7, %s2104_s6, %s2105_s16  }
  0x5e   : > { %399 = sbr.rel (%p2243_p3) target bundleno = 869 (0x365), region = 52  ;;  %s401_s25 = sand.u32 (!%p2243_p3), 1, %s2064_s12  }
  0x5f   : > { %s1259_s24 = sshll.u32 (!%p2243_p3), %s401_s25, 6  ;;  %s402_s11 = scalar_lea.sflag (!%p2243_p3), [#allocation4], %s401_s25 }
  0x60   : > { %s2406_s14 = scalar_lea.vmem (!%p2243_p3), [#allocation3], %s1259_s24 }
  0x63   : > { %2011 = dma.done.wait (%p2351_p7), %s402_s11, 1024  }
  0x64   : > { %2013 = vsyncadd (%p2351_p7), %s402_s11, 4294966272  ;;  %s2666_s9 = sld [smem:[#allocation22_spill]]  ;;  %s411_s3 = sand.u32 1, %s2235_s21  }
  0x65   : > { %s412_s23 = scalar_lea.sflag [#allocation7], %s411_s3 }
  0x6a   : > { %s2414_s30 = sand.u32 1, %s2666_s9  }
  0x6b   : > { %s1260_s0 = sshll.u32 %s2414_s30, 5 }
  0x6c   : > { %s2417_s15 = scalar_lea.vmem [#allocation6], %s1260_s0 }
  0x6d   : > { %2015 = dma.done.wait (%p2277_p12), %s412_s23, 512  }
  0x6e   : > { %2017 = vsyncadd (%p2277_p12), %s412_s23, 4294966784  ;;  %s423_s8 = sand.u32 1, %s2040_s28  }
  0x6f   : > { %s2424_s1 = sshll.u32 %s423_s8, 4 }
  0x70   : > { %s425_s22 = scalar_lea.vmem [#allocation8], %s2424_s1 }
  0x71   : > { %2019 = dma.done.wait (%p2393_p9), %s412_s23, 256  }
  0x72   : > { %2021 = vsyncadd (%p2393_p9), %s412_s23, 4294967040 }
  0x73   : > { %2023 = dma.done.wait (%p69_p1), [#allocation10], 4096  }
  0x74   : > { %2025 = vsyncadd (%p69_p1), [#allocation10], 4294963200 }
  0x75   : > { %2027 = dma.done.wait (%p69_p1), [#allocation13], 3072  }
  0x76   : > { %2029 = vsyncadd (%p69_p1), [#allocation13], 4294964224  ;;  %s2668_s27 = sld [smem:[#allocation25_spill]]  ;;  %s1265_s6 = sshll.u32 %s2414_s30, 6 }
  0x77   : > { %s2669_s7 = sld [smem:[#allocation24_spill]]  ;;  %s2442_s4 = scalar_lea.vmem [#allocation14], %s1265_s6 }
  0x7c   : > { %p488_p3 = scmp.eq.s32.totalorder %s2668_s27, 0 }
  0x7d   : > { %p489_p6 = scmp.eq.s32.totalorder %s2669_s7, 0 }
  0x7f   : > { %p490_p12 = pnand %p489_p6, %p488_p3 }
  0x80   : > { %s2670_s25 = sld [smem:[#allocation38_spill]] (!%p490_p12) }
  0x81   : > { %493 = sbr.rel (%p490_p12) target bundleno = 311 (0x137), region = 80 }
  0x86   : > { %v1434_v0 = vld [vmem:[#allocation9 + $0x38] sm:$0xff]  ;;  %v1433_v1 = vld [vmem:[#allocation9 + $0x30] sm:$0xff]  ;;  %v1432_v2 = vld [vmem:[#allocation9 + $0x28] sm:$0xff] }
  0x87   : > { %594 = vmatpush.bf16.msra.mxu0 %v1434_v0  ;;  %1481 = vmatpush.bf16.msra.mxu1 %v1434_v0  ;;  %v1431_v3 = vld [vmem:[#allocation9 + $0x20] sm:$0xff]  ;;  %v1430_v4 = vld [vmem:[#allocation9 + $0x18] sm:$0xff]  ;;  %v1429_v5 = vld [vmem:[#allocation9 + $0x10] sm:$0xff] }
  0x88   : > { %1482 = vmatpush.bf16.msra.mxu2 %v1434_v0  ;;  %1483 = vmatpush.bf16.msra.mxu3 %v1434_v0  ;;  %v1428_v6 = vld [vmem:[#allocation9 + $0x8] sm:$0xff]  ;;  %v1427_v7 = vld [vmem:[#allocation9] sm:$0xff]  ;;  %v1425_v10 = vld [vmem:[%s2417_s15 + $0x10] sm:$0xff] }
  0x89   : > { %v1423_v8 = vld [vmem:[%s2417_s15] sm:$0xff]  ;;  %v1424_v9 = vld [vmem:[%s2417_s15 + $0x8] sm:$0xff]  ;;  %v1426_v11 = vld [vmem:[%s2417_s15 + $0x18] sm:$0xff] }
  0x8a   : > { %v1736_v12 = vld [vmem:[%s2670_s25] ss:$0 sm:$0xff] }
  0x8b   : > { %595 = vmatpush.bf16.msra.mxu0 %v1433_v1  ;;  %1484 = vmatpush.bf16.msra.mxu1 %v1433_v1 }
  0x8c   : > { %1485 = vmatpush.bf16.msra.mxu2 %v1433_v1  ;;  %1486 = vmatpush.bf16.msra.mxu3 %v1433_v1 }
  0x8f   : > { %596 = vmatpush.bf16.msra.mxu0 %v1432_v2  ;;  %1487 = vmatpush.bf16.msra.mxu1 %v1432_v2 }
  0x90   : > { %1488 = vmatpush.bf16.msra.mxu2 %v1432_v2  ;;  %1489 = vmatpush.bf16.msra.mxu3 %v1432_v2 }
  0x93   : > { %597 = vmatpush.bf16.msra.mxu0 %v1431_v3  ;;  %1490 = vmatpush.bf16.msra.mxu1 %v1431_v3 }
  0x94   : > { %1491 = vmatpush.bf16.msra.mxu2 %v1431_v3  ;;  %1492 = vmatpush.bf16.msra.mxu3 %v1431_v3 }
  0x97   : > { %598 = vmatpush.bf16.msra.mxu0 %v1430_v4  ;;  %1493 = vmatpush.bf16.msra.mxu1 %v1430_v4 }
  0x98   : > { %1494 = vmatpush.bf16.msra.mxu2 %v1430_v4  ;;  %1495 = vmatpush.bf16.msra.mxu3 %v1430_v4 }
  0x9b   : > { %599 = vmatpush.bf16.msra.mxu0 %v1429_v5  ;;  %1496 = vmatpush.bf16.msra.mxu1 %v1429_v5 }
  0x9c   : > { %1497 = vmatpush.bf16.msra.mxu2 %v1429_v5  ;;  %1498 = vmatpush.bf16.msra.mxu3 %v1429_v5 }
  0x9f   : > { %600 = vmatpush.bf16.msra.mxu0 %v1428_v6  ;;  %1499 = vmatpush.bf16.msra.mxu1 %v1428_v6 }
  0xa0   : > { %1500 = vmatpush.bf16.msra.mxu2 %v1428_v6  ;;  %1501 = vmatpush.bf16.msra.mxu3 %v1428_v6 }
  0xa3   : > { %601 = vmatpush.bf16.msra.mxu0 %v1427_v7  ;;  %1502 = vmatpush.bf16.msra.mxu1 %v1427_v7 }
  0xa4   : > { %1503 = vmatpush.bf16.msra.mxu2 %v1427_v7  ;;  %1504 = vmatpush.bf16.msra.mxu3 %v1427_v7 }
  0xa6   : > { %602 = vmatmul.bf16.vlgmr.msra.gmra.mxu0 %v1423_v8  ;;  %607 = vmatmul.bf16.vlgmr.msra.gmra.mxu1 %v1424_v9 }
  0xa7   : > { %612 = vmatmul.bf16.vlgmr.msra.gmra.mxu2 %v1425_v10  ;;  %617 = vmatmul.bf16.vlgmr.msra.gmra.mxu3 %v1426_v11 }
 0x123   : > { %v603_v13 = vpop.f32.mrf.mxu0  ;;  %v608_v14 = vpop.f32.mrf.mxu1 }
 0x124   : > { %v604_v15 = vadd.f32 %v1736_v12, %v603_v13  ;;  %v609_v16 = vadd.f32 %v1736_v12, %v608_v14 }
 0x126   : > { %623 = vst [vmem:[%s2442_s4] sm:$0xff] %v604_v15 }
 0x127   : > { %625 = vst [vmem:[%s2442_s4 + $0x10] sm:$0xff] %v609_v16 }
 0x12a   : > { %v613_v17 = vpop.f32.mrf.mxu2  ;;  %v618_v18 = vpop.f32.mrf.mxu3 }
 0x12b   : > { %v614_v19 = vadd.f32 %v1736_v12, %v613_v17  ;;  %v619_v20 = vadd.f32 %v1736_v12, %v618_v18  ;;  %v605_v21 = vpop.f32.mrf.mxu0  ;;  %v610_v22 = vpop.f32.mrf.mxu1 }
 0x12c   : > { %v606_v23 = vadd.f32 %v1736_v12, %v605_v21  ;;  %v611_v24 = vadd.f32 %v1736_v12, %v610_v22 }
 0x12d   : > { %627 = vst [vmem:[%s2442_s4 + $0x20] sm:$0xff] %v614_v19 }
 0x12e   : > { %629 = vst [vmem:[%s2442_s4 + $0x30] sm:$0xff] %v619_v20 }
 0x12f   : > { %624 = vst [vmem:[%s2442_s4 + $0x8] sm:$0xff] %v606_v23 }
 0x130   : > { %626 = vst [vmem:[%s2442_s4 + $0x18] sm:$0xff] %v611_v24 }
 0x132   : > { %v615_v25 = vpop.f32.mrf.mxu2  ;;  %v620_v26 = vpop.f32.mrf.mxu3 }
 0x133   : > { %v616_v27 = vadd.f32 %v1736_v12, %v615_v25  ;;  %v621_v28 = vadd.f32 %v1736_v12, %v620_v26 }
 0x135   : > { %628 = vst [vmem:[%s2442_s4 + $0x28] sm:$0xff] %v616_v27 }
 0x136   : > { %630 = vst [vmem:[%s2442_s4 + $0x38] sm:$0xff] %v621_v28 }
 0x137 PF: > { %s2671_s24 = sld [smem:[#allocation24_spill]] }
 0x13d   : > { %p1314_p1 = scmp.ne.s32.totalorder %s2671_s24, 0 }
 0x13f   : > { %633 = sbr.rel (%p1314_p1) target bundleno = 333 (0x14d), region = 84 }
 0x144   : > { %v2106_v29 = vmov 0.0  }
 0x145   : > { %634 = vst [vmem:[#allocation2 + $0x30] sm:$0xff] %v2106_v29 }
 0x146   : > { %635 = vst [vmem:[#allocation2] sm:$0xff] %v2106_v29 }
 0x147   : > { %636 = vst [vmem:[#allocation2 + $0x18] sm:$0xff] %v2106_v29 }
 0x148   : > { %637 = vst [vmem:[#allocation2 + $0x10] sm:$0xff] %v2106_v29 }
 0x149   : > { %638 = vst [vmem:[#allocation2 + $0x8] sm:$0xff] %v2106_v29 }
 0x14a   : > { %639 = vst [vmem:[#allocation2 + $0x20] sm:$0xff] %v2106_v29 }
 0x14b   : > { %640 = vst [vmem:[#allocation2 + $0x28] sm:$0xff] %v2106_v29 }
 0x14c   : > { %641 = vst [vmem:[#allocation2 + $0x38] sm:$0xff] %v2106_v29 }
 0x14d PF: > { %v1442_v30 = vld [vmem:[%s2406_s14 + $0x38] sm:$0xff]  ;;  %v1441_v31 = vld [vmem:[%s2406_s14 + $0x30] sm:$0xff]  ;;  %v1440_v32 = vld [vmem:[%s2406_s14 + $0x28] sm:$0xff]  ;;  %s2672_s11 = sld [smem:[#allocation24_spill]] }
 0x14e   : > { %736 = vmatpush.bf16.msra.mxu0 %v1442_v30  ;;  %1505 = vmatpush.bf16.msra.mxu1 %v1442_v30  ;;  %v1439_v33 = vld [vmem:[%s2406_s14 + $0x20] sm:$0xff]  ;;  %v1438_v34 = vld [vmem:[%s2406_s14 + $0x18] sm:$0xff]  ;;  %v1437_v35 = vld [vmem:[%s2406_s14 + $0x10] sm:$0xff] }
 0x14f   : > { %1506 = vmatpush.bf16.msra.mxu2 %v1442_v30  ;;  %1507 = vmatpush.bf16.msra.mxu3 %v1442_v30  ;;  %v642_v36 = vld [vmem:[%s425_s22] sm:$0xff]  ;;  %v643_v37 = vld [vmem:[%s425_s22 + $0x8] sm:$0xff] }
 0x150   : > { %v644_v38 = vunpack.c.0.s8 %v642_v36  ;;  %v645_v39 = vunpack.c.1.s8 %v642_v36  ;;  %v646_v40 = vunpack.c.2.s8 %v642_v36  ;;  %v647_v41 = vunpack.c.3.s8 %v642_v36  ;;  %v1436_v42 = vld [vmem:[%s2406_s14 + $0x8] sm:$0xff]  ;;  %v1435_v51 = vld [vmem:[%s2406_s14] sm:$0xff]  ;;  %v664_v60 = vld [vmem:[#allocation2 + $0x30] sm:$0xff] }
 0x151   : > { %v648_v43 = vunpack.c.0.s8 %v643_v37  ;;  %v649_v44 = vunpack.c.1.s8 %v643_v37  ;;  %v650_v45 = vunpack.c.2.s8 %v643_v37  ;;  %v651_v46 = vunpack.c.3.s8 %v643_v37  ;;  %v666_v61 = vld [vmem:[#allocation2 + $0x18] sm:$0xff]  ;;  %v668_v2 = vld [vmem:[#allocation2 + $0x8] sm:$0xff]  ;;  %v665_v4 = vld [vmem:[#allocation2] sm:$0xff] }
 0x152   : > { %737 = vmatpush.bf16.msra.mxu0 %v1441_v31  ;;  %1508 = vmatpush.bf16.msra.mxu1 %v1441_v31  ;;  %v652_v47 = vcvt.s32.f32 %v644_v38  ;;  %v653_v48 = vcvt.s32.f32 %v645_v39  ;;  %v654_v49 = vcvt.s32.f32 %v646_v40  ;;  %v655_v50 = vcvt.s32.f32 %v647_v41  ;;  %v670_v3 = vld [vmem:[#allocation2 + $0x28] sm:$0xff]  ;;  %v667_v5 = vld [vmem:[#allocation2 + $0x10] sm:$0xff]  ;;  %v669_v14 = vld [vmem:[#allocation2 + $0x20] sm:$0xff] }
 0x153   : > { %1509 = vmatpush.bf16.msra.mxu2 %v1441_v31  ;;  %1510 = vmatpush.bf16.msra.mxu3 %v1441_v31  ;;  %v656_v52 = vcvt.s32.f32 %v648_v43  ;;  %v657_v53 = vcvt.s32.f32 %v649_v44  ;;  %v658_v54 = vcvt.s32.f32 %v650_v45  ;;  %v659_v55 = vcvt.s32.f32 %v651_v46  ;;  %v671_v15 = vld [vmem:[#allocation2 + $0x38] sm:$0xff]  ;;  %p1347_p2 = scmp.ne.s32.totalorder %s2672_s11, 1 }
 0x154   : > { %v660_v56 = vpack.c.bf16 %v653_v48, %v652_v47  ;;  %v661_v57 = vpack.c.bf16 %v655_v50, %v654_v49  ;;  %s2673_s14 = sld [smem:[#allocation25_spill]] (!%p1347_p2) }
 0x155   : > { %v662_v58 = vpack.c.bf16 %v657_v53, %v656_v52  ;;  %v663_v59 = vpack.c.bf16 %v659_v55, %v658_v54  ;;  %s2674_s23 = sld [smem:[#allocation40_spill]] (!%p1347_p2) }
 0x156   : > { %738 = vmatpush.bf16.msra.mxu0 %v1440_v32  ;;  %1511 = vmatpush.bf16.msra.mxu1 %v1440_v32 }
 0x157   : > { %1512 = vmatpush.bf16.msra.mxu2 %v1440_v32  ;;  %1513 = vmatpush.bf16.msra.mxu3 %v1440_v32 }
 0x15a   : > { %739 = vmatpush.bf16.msra.mxu0 %v1439_v33  ;;  %1514 = vmatpush.bf16.msra.mxu1 %v1439_v33  ;;  %s1443_s9 = sshll.u32 (!%p1347_p2), %s2673_s14, 6 }
 0x15b   : > { %1515 = vmatpush.bf16.msra.mxu2 %v1439_v33  ;;  %1516 = vmatpush.bf16.msra.mxu3 %v1439_v33  ;;  %s2474_s26 = scalar_lea.vmem (!%p1347_p2), [#allocation11], %s1443_s9  ;;  %s840_s8 = scalar_lea.vmem (!%p1347_p2), %s2674_s23, %s2673_s14 }
 0x15c   : > { %s2485_s1 = scalar_lea.vmem (!%p1347_p2), [#allocation12], %s1443_s9 }
 0x15e   : > { %740 = vmatpush.bf16.msra.mxu0 %v1438_v34  ;;  %1517 = vmatpush.bf16.msra.mxu1 %v1438_v34 }
 0x15f   : > { %1518 = vmatpush.bf16.msra.mxu2 %v1438_v34  ;;  %1519 = vmatpush.bf16.msra.mxu3 %v1438_v34 }
 0x162   : > { %741 = vmatpush.bf16.msra.mxu0 %v1437_v35  ;;  %1520 = vmatpush.bf16.msra.mxu1 %v1437_v35 }
 0x163   : > { %1521 = vmatpush.bf16.msra.mxu2 %v1437_v35  ;;  %1522 = vmatpush.bf16.msra.mxu3 %v1437_v35 }
 0x166   : > { %742 = vmatpush.bf16.msra.mxu0 %v1436_v42  ;;  %1523 = vmatpush.bf16.msra.mxu1 %v1436_v42 }
 0x167   : > { %1524 = vmatpush.bf16.msra.mxu2 %v1436_v42  ;;  %1525 = vmatpush.bf16.msra.mxu3 %v1436_v42 }
 0x16a   : > { %743 = vmatpush.bf16.msra.mxu0 %v1435_v51  ;;  %1526 = vmatpush.bf16.msra.mxu1 %v1435_v51 }
 0x16b   : > { %1527 = vmatpush.bf16.msra.mxu2 %v1435_v51  ;;  %1528 = vmatpush.bf16.msra.mxu3 %v1435_v51 }
 0x16d   : > { %744 = vmatmul.bf16.vlgmr.msra.gmra.mxu0 %v660_v56  ;;  %749 = vmatmul.bf16.vlgmr.msra.gmra.mxu1 %v661_v57 }
 0x16e   : > { %754 = vmatmul.bf16.vlgmr.msra.gmra.mxu2 %v662_v58  ;;  %759 = vmatmul.bf16.vlgmr.msra.gmra.mxu3 %v663_v59 }
 0x1ea   : > { %v745_v62 = vpop.f32.mrf.mxu0  ;;  %v750_v63 = vpop.f32.mrf.mxu1 }
 0x1eb   : > { %v765_v0 = vadd.f32 %v745_v62, %v664_v60  ;;  %v767_v1 = vadd.f32 %v750_v63, %v666_v61 }
 0x1ed   : > { %773 = vst [vmem:[#allocation2 + $0x30] sm:$0xff] %v765_v0 }
 0x1ee   : > { %775 = vst [vmem:[#allocation2 + $0x18] sm:$0xff] %v767_v1 }
 0x1f1   : > { %v755_v6 = vpop.f32.mrf.mxu2  ;;  %v760_v7 = vpop.f32.mrf.mxu3 }
 0x1f2   : > { %v769_v8 = vadd.f32 %v755_v6, %v668_v2  ;;  %v771_v9 = vadd.f32 %v760_v7, %v670_v3  ;;  %v747_v10 = vpop.f32.mrf.mxu0  ;;  %v752_v11 = vpop.f32.mrf.mxu1 }
 0x1f3   : > { %v766_v12 = vadd.f32 %v747_v10, %v665_v4  ;;  %v768_v13 = vadd.f32 %v752_v11, %v667_v5 }
 0x1f4   : > { %777 = vst [vmem:[#allocation2 + $0x8] sm:$0xff] %v769_v8 }
 0x1f5   : > { %779 = vst [vmem:[#allocation2 + $0x28] sm:$0xff] %v771_v9 }
 0x1f6   : > { %774 = vst [vmem:[#allocation2] sm:$0xff] %v766_v12 }
 0x1f7   : > { %776 = vst [vmem:[#allocation2 + $0x10] sm:$0xff] %v768_v13 }
 0x1f9   : > { %v757_v16 = vpop.f32.mrf.mxu2  ;;  %v762_v17 = vpop.f32.mrf.mxu3  ;;  %784 = sbr.rel (%p1347_p2) target bundleno = 847 (0x34f), region = 88 }
 0x1fa   : > { %v770_v18 = vadd.f32 %v757_v16, %v669_v14  ;;  %v772_v19 = vadd.f32 %v762_v17, %v671_v15 }
 0x1fc   : > { %778 = vst [vmem:[#allocation2 + $0x20] sm:$0xff] %v770_v18 }
 0x1fd   : > { %780 = vst [vmem:[#allocation2 + $0x38] sm:$0xff] %v772_v19 }
 0x1fe   : > { %v1451_v20 = vld [vmem:[%s2474_s26 + $0x38] sm:$0xff]  ;;  %v1450_v21 = vld [vmem:[%s2474_s26 + $0x30] sm:$0xff]  ;;  %v1449_v22 = vld [vmem:[%s2474_s26 + $0x28] sm:$0xff] }
 0x1ff   : > { %893 = vmatpush.bf16.msra.mxu0 %v1451_v20  ;;  %1529 = vmatpush.bf16.msra.mxu2 %v1451_v20  ;;  %v1448_v23 = vld [vmem:[%s2474_s26 + $0x20] sm:$0xff]  ;;  %v1447_v24 = vld [vmem:[%s2474_s26 + $0x18] sm:$0xff]  ;;  %v1446_v26 = vld [vmem:[%s2474_s26 + $0x10] sm:$0xff] }
 0x200   : > { %v1460_v25 = vld [vmem:[%s2485_s1 + $0x38] sm:$0xff]  ;;  %v1463_v27 = vld [vmem:[%s2417_s15] sm:$0xff]   ;;  %v1479_v28 = vld [vmem:[%s2417_s15 + $0x10] sm:$0xff]  }
 0x201   : > { %1008 = vmatpush.bf16.msra.mxu1 %v1460_v25  ;;  %v1459_v29 = vld [vmem:[%s2485_s1 + $0x30] sm:$0xff]  ;;  %1537 = vmatpush.bf16.msra.mxu3 %v1460_v25  ;;  %v1464_v30 = vunpack.c.l.bf16 %v1463_v27  ;;  %v1465_v31 = vunpack.c.h.bf16 %v1463_v27  ;;  %v802_v33 = vld [vmem:[#allocation2] sm:$0xff]  ;;  %v1472_v34 = vunpack.c.l.bf16 %v1479_v28  ;;  %v1473_v35 = vunpack.c.h.bf16 %v1479_v28  ;;  %v1445_v36 = vld [vmem:[%s2474_s26 + $0x8] sm:$0xff] }
 0x202   : > { %v801_v32 = vld [vmem:[#allocation2 + $0x30] sm:$0xff]  ;;  %v805_v37 = vld [vmem:[#allocation2 + $0x8] sm:$0xff]  ;;  %v1444_v44 = vld [vmem:[%s2474_s26] sm:$0xff] }
 0x203   : > { %894 = vmatpush.bf16.msra.mxu0 %v1450_v21  ;;  %1530 = vmatpush.bf16.msra.mxu2 %v1450_v21  ;;  %v806_v38 = vld [vmem:[#allocation2 + $0x20] sm:$0xff]  ;;  %v1458_v39 = vld [vmem:[%s2485_s1 + $0x28] sm:$0xff]  ;;  %v809_v40 = vadd.f32 %v1464_v30, %v801_v32  ;;  %v810_v41 = vadd.f32 %v1465_v31, %v802_v33  ;;  %v813_v42 = vadd.f32 %v1472_v34, %v805_v37  ;;  %v1480_v49 = vld [vmem:[%s2417_s15 + $0x18] sm:$0xff]  }
 0x204   : > { %v814_v43 = vadd.f32 %v1473_v35, %v806_v38  ;;  %v1457_v45 = vld [vmem:[%s2485_s1 + $0x20] sm:$0xff]  ;;  %v1478_v48 = vld [vmem:[%s2417_s15 + $0x8] sm:$0xff]   ;;  %v803_v52 = vld [vmem:[#allocation2 + $0x18] sm:$0xff]  ;;  %v1476_v53 = vunpack.c.l.bf16 %v1480_v49  ;;  %v1477_v54 = vunpack.c.h.bf16 %v1480_v49 }
 0x205   : > { %1009 = vmatpush.bf16.msra.mxu1 %v1459_v29  ;;  %1538 = vmatpush.bf16.msra.mxu3 %v1459_v29  ;;  %v817_v46 = vpack.c.bf16 %v810_v41, %v809_v40  ;;  %v1468_v50 = vunpack.c.l.bf16 %v1478_v48  ;;  %v1469_v51 = vunpack.c.h.bf16 %v1478_v48  ;;  %v804_v55 = vld [vmem:[#allocation2 + $0x10] sm:$0xff]  ;;  %v807_v56 = vld [vmem:[#allocation2 + $0x28] sm:$0xff]  ;;  %v808_v57 = vld [vmem:[#allocation2 + $0x38] sm:$0xff] }
 0x206   : > { %v819_v47 = vpack.c.bf16 %v814_v43, %v813_v42  ;;  %v815_v60 = vadd.f32 %v1476_v53, %v807_v56  ;;  %v816_v61 = vadd.f32 %v1477_v54, %v808_v57  ;;  %v1456_v0 = vld [vmem:[%s2485_s1 + $0x18] sm:$0xff]  ;;  %v1455_v1 = vld [vmem:[%s2485_s1 + $0x10] sm:$0xff]  ;;  %v1454_v2 = vld [vmem:[%s2485_s1 + $0x8] sm:$0xff] }
 0x207   : > { %895 = vmatpush.bf16.msra.mxu0 %v1449_v22  ;;  %1531 = vmatpush.bf16.msra.mxu2 %v1449_v22  ;;  %v811_v58 = vadd.f32 %v1468_v50, %v803_v52  ;;  %v812_v59 = vadd.f32 %v1469_v51, %v804_v55  ;;  %v1453_v3 = vld [vmem:[%s2485_s1] sm:$0xff]  ;;  %v936_v42 = vld [vmem:[%s2442_s4 + $0x10] sm:$0xff]  ;;  %v937_v48 = vld [vmem:[%s2442_s4 + $0x18] sm:$0xff] }
 0x208   : > { %v820_v63 = vpack.c.bf16 %v816_v61, %v815_v60  ;;  %v1737_v5 = vld [vmem:[%s840_s8] ss:$0 sm:$0xff]  ;;  %v940_v51 = vld [vmem:[%s2442_s4 + $0x30] sm:$0xff]  ;;  %v941_v54 = vld [vmem:[%s2442_s4 + $0x38] sm:$0xff] }
 0x209   : > { %1010 = vmatpush.bf16.msra.mxu1 %v1458_v39  ;;  %1539 = vmatpush.bf16.msra.mxu3 %v1458_v39  ;;  %v818_v62 = vpack.c.bf16 %v812_v59, %v811_v58  ;;  %v934_v33 = vld [vmem:[%s2442_s4] sm:$0xff] }
 0x20a   : > { %v938_v39 = vld [vmem:[%s2442_s4 + $0x20] sm:$0xff] }
 0x20b   : > { %896 = vmatpush.bf16.msra.mxu0 %v1448_v23  ;;  %1532 = vmatpush.bf16.msra.mxu2 %v1448_v23 }
 0x20d   : > { %1011 = vmatpush.bf16.msra.mxu1 %v1457_v45  ;;  %1540 = vmatpush.bf16.msra.mxu3 %v1457_v45  ;;  %v939_v45 = vld [vmem:[%s2442_s4 + $0x28] sm:$0xff] }
 0x20f   : > { %897 = vmatpush.bf16.msra.mxu0 %v1447_v24  ;;  %1533 = vmatpush.bf16.msra.mxu2 %v1447_v24 }
 0x211   : > { %1012 = vmatpush.bf16.msra.mxu1 %v1456_v0  ;;  %1541 = vmatpush.bf16.msra.mxu3 %v1456_v0 }
 0x213   : > { %898 = vmatpush.bf16.msra.mxu0 %v1446_v26  ;;  %1534 = vmatpush.bf16.msra.mxu2 %v1446_v26 }
 0x215   : > { %1013 = vmatpush.bf16.msra.mxu1 %v1455_v1  ;;  %1542 = vmatpush.bf16.msra.mxu3 %v1455_v1 }
 0x217   : > { %899 = vmatpush.bf16.msra.mxu0 %v1445_v36  ;;  %1535 = vmatpush.bf16.msra.mxu2 %v1445_v36  ;;  %v935_v36 = vld [vmem:[%s2442_s4 + $0x8] sm:$0xff] }
 0x219   : > { %1014 = vmatpush.bf16.msra.mxu1 %v1454_v2  ;;  %1543 = vmatpush.bf16.msra.mxu3 %v1454_v2 }
 0x21b   : > { %900 = vmatpush.bf16.msra.mxu0 %v1444_v44  ;;  %1536 = vmatpush.bf16.msra.mxu2 %v1444_v44 }
 0x21d   : > { %1015 = vmatpush.bf16.msra.mxu1 %v1453_v3  ;;  %1544 = vmatpush.bf16.msra.mxu3 %v1453_v3 }
 0x21e   : > { %901 = vmatmul.bf16.vlgmr.msra.gmra.mxu0 %v817_v46  ;;  %911 = vmatmul.bf16.vlgmr.msra.gmra.mxu2 %v819_v47 }
 0x22e   : > { %906 = vmatmul.bf16.gmra.mxu0 %v818_v62  ;;  %916 = vmatmul.bf16.gmra.mxu2 %v820_v63 }
 0x29b   : > { %v902_v4 = vpop.f32.mrf.mxu0 }
 0x29c   : > { %v903_v6 = vadd.f32 %v1737_v5, %v902_v4 }
 0x29e   : > { %v922_v9 = vmax.f32 %v903_v6, 0.0 }
 0x2a1   : > { %v912_v7 = vpop.f32.mrf.mxu2 }
 0x2a2   : > { %v913_v12 = vadd.f32 %v1737_v5, %v912_v7 }
 0x2a3   : > { %v904_v8 = vpop.f32.mrf.mxu0 }
 0x2a4   : > { %v905_v10 = vadd.f32 %v1737_v5, %v904_v8  ;;  %v926_v17 = vmax.f32 %v913_v12, 0.0 }
 0x2a6   : > { %v923_v11 = vmax.f32 %v905_v10, 0.0 }
 0x2a8   : > { %v930_v13 = vpack.c.bf16 %v923_v11, %v922_v9 }
 0x2a9   : > { %v914_v14 = vpop.f32.mrf.mxu2 }
 0x2aa   : > { %v915_v15 = vadd.f32 %v1737_v5, %v914_v14  ;;  %1016 = vmatmul.bf16.vlgmr.msra.gmra.mxu1 %v930_v13 }
 0x2ab   : > { %v907_v16 = vpop.f32.mrf.mxu0 }
 0x2ac   : > { %v927_v18 = vmax.f32 %v915_v15, 0.0  ;;  %v908_v20 = vadd.f32 %v1737_v5, %v907_v16 }
 0x2ae   : > { %v932_v19 = vpack.c.bf16 %v927_v18, %v926_v17  ;;  %v924_v23 = vmax.f32 %v908_v20, 0.0 }
 0x2b0   : > { %1026 = vmatmul.bf16.vlgmr.msra.gmra.mxu3 %v932_v19 }
 0x2b1   : > { %v917_v21 = vpop.f32.mrf.mxu2 }
 0x2b2   : > { %v918_v26 = vadd.f32 %v1737_v5, %v917_v21 }
 0x2b3   : > { %v909_v22 = vpop.f32.mrf.mxu0 }
 0x2b4   : > { %v910_v24 = vadd.f32 %v1737_v5, %v909_v22  ;;  %v928_v30 = vmax.f32 %v918_v26, 0.0 }
 0x2b6   : > { %v925_v25 = vmax.f32 %v910_v24, 0.0 }
 0x2b8   : > { %v931_v27 = vpack.c.bf16 %v925_v25, %v924_v23 }
 0x2b9   : > { %v919_v28 = vpop.f32.mrf.mxu2 }
 0x2ba   : > { %v920_v29 = vadd.f32 %v1737_v5, %v919_v28  ;;  %1021 = vmatmul.bf16.gmra.mxu1 %v931_v27 }
 0x2bc   : > { %v929_v31 = vmax.f32 %v920_v29, 0.0 }
 0x2be   : > { %v933_v32 = vpack.c.bf16 %v929_v31, %v928_v30 }
 0x2c0   : > { %1031 = vmatmul.bf16.gmra.mxu3 %v933_v32 }
 0x327   : > { %v1017_v34 = vpop.f32.mrf.mxu1 }
 0x328   : > { %v1037_v35 = vadd.f32 %v1017_v34, %v934_v33 }
 0x32a   : > { %1045 = vst [vmem:[%s2442_s4] sm:$0xff] %v1037_v35 }
 0x32f   : > { %v1019_v37 = vpop.f32.mrf.mxu1 }
 0x330   : > { %v1038_v38 = vadd.f32 %v1019_v37, %v935_v36 }
 0x332   : > { %1046 = vst [vmem:[%s2442_s4 + $0x8] sm:$0xff] %v1038_v38 }
 0x333   : > { %v1027_v40 = vpop.f32.mrf.mxu3 }
 0x334   : > { %v1041_v41 = vadd.f32 %v1027_v40, %v938_v39 }
 0x336   : > { %1049 = vst [vmem:[%s2442_s4 + $0x20] sm:$0xff] %v1041_v41 }
 0x337   : > { %v1022_v43 = vpop.f32.mrf.mxu1 }
 0x338   : > { %v1039_v44 = vadd.f32 %v1022_v43, %v936_v42 }
 0x33a   : > { %1047 = vst [vmem:[%s2442_s4 + $0x10] sm:$0xff] %v1039_v44 }
 0x33b   : > { %v1029_v46 = vpop.f32.mrf.mxu3 }
 0x33c   : > { %v1042_v47 = vadd.f32 %v1029_v46, %v939_v45 }
 0x33e   : > { %1050 = vst [vmem:[%s2442_s4 + $0x28] sm:$0xff] %v1042_v47 }
 0x33f   : > { %v1024_v49 = vpop.f32.mrf.mxu1 }
 0x340   : > { %v1040_v50 = vadd.f32 %v1024_v49, %v937_v48 }
 0x342   : > { %1048 = vst [vmem:[%s2442_s4 + $0x18] sm:$0xff] %v1040_v50 }
 0x343   : > { %v1032_v52 = vpop.f32.mrf.mxu3 }
 0x344   : > { %v1043_v53 = vadd.f32 %v1032_v52, %v940_v51 }
 0x346   : > { %1051 = vst [vmem:[%s2442_s4 + $0x30] sm:$0xff] %v1043_v53 }
 0x34b   : > { %v1034_v55 = vpop.f32.mrf.mxu3 }
 0x34c   : > { %v1044_v56 = vadd.f32 %v1034_v55, %v941_v54 }
 0x34e   : > { %1052 = vst [vmem:[%s2442_s4 + $0x38] sm:$0xff] %v1044_v56 }
 0x34f PF: > { %s2675_s27 = sld [smem:[#allocation26_spill]]  ;;  %s1066_s11 = sshll.u32 %s2442_s4, 4  ;;  %s1067_s11 = int_to_ptr.vmem [resolvable:$true] %s1066_s11 }
 0x350   : > { %s2677_s25 = sld [smem:[#allocation42_spill]]  ;;  %s1054_s9 = scalar_lea.sflag [#allocation5], %s2414_s30 }
 0x355   : > { %s1461_s6 = sshll.u32 %s2675_s27, 6 }
 0x356   : > { %s1065_s24 = scalar_lea.hbm %s2677_s25, %s1461_s6  ;;  %s1938_s1 = scalar_lea.hbm %s2677_s25, 256 }
 0x357   : > { %s1068_s14 = sshll.u32 %s1065_s24, 4  ;;  %s1069_s14 = int_to_ptr.hbm [resolvable:$true] %s1068_s14 }
 0x358   : > { %s1932_s26 = sshra.s32 %s1069_s14, 4  ;;  %s1933_s26 = int_to_ptr.hbm [resolvable:$true] %s1932_s26 }
 0x359   : > { %s1934_s3 = scalar_lea.hbm %s1933_s26, 64  ;;  %p1939_p4 = scmp.lt.s32.totalorder %s1933_s26, %s2677_s25 }
 0x35a   : > { %p1935_p7 = scmp.ne.s32.totalorder %s1933_s26, %s1934_s3  ;;  %p1940_p8 = scmp.lt.s32.totalorder %s1938_s1, %s1934_s3 }
 0x35c   : > { %p1936_p10 = pnand %p1935_p7, %p2281_p13  ;;  %p1941_p9 = por %p1940_p8, %p1939_p4 }
 0x35e   : > { %p1937_p11 = pneg %p1936_p10 }
 0x360   : > { %p1942_p5 = pnand %p1941_p9, %p1937_p11 }
 0x362   : > { %1945 = shalt.err (!%p1942_p5)
}
 0x363   : > { %s2107_s30 = smov 128   ;;  %s2108_s4 = smov 8  }
 0x364   : > { %1563 = dma.vmem_to_hbm [thread:$0]  (%p2281_p13), %s1067_s11, 1024, %s1069_s14, %s1054_s9, %s2107_s30, %s2107_s30, %s2108_s4  }
 0x365 PF: > { %s2678_s27 = sld [smem:[#allocation21_spill]]  ;;  %p1596_p3 = scmp.ge.s32.totalorder %s2096_s20, 2 }
 0x367   : > { %p1586_p6 = pnand %p1596_p3, %p2285_p0 }
 0x369   : > { %p1587_p12 = pneg %p1586_p6 }
 0x36b   : > { %s1083_s21 = sand.u32 1, %s2678_s27  }
 0x36c   : > { %s1084_s16 = scalar_lea.sflag [#allocation5], %s1083_s21 }
 0x36d   : > { %2031 = dma.done.wait (%p1587_p12), %s1084_s16, 1024  }
 0x36e   : > { %2033 = vsyncadd (%p1587_p12), %s1084_s16, 4294966272  ;;  %s29_s20 = sadd.s32 1, %s2096_s20   ;;  %s2681_s30 = sld [smem:[#allocation22_spill]] }
 0x36f   : > { %p2544_p1 = scmp.ge.s32.totalorder %s29_s20, 26   ;;  %s2682_s7 = sld [smem:[#allocation23_spill]] }
 0x370   : > { %s2683_s14 = sld [smem:[#allocation33_spill]]  ;;  %s2687_s27 = smov %s2040_s28 }
 0x371   : > { %s2684_s26 = sld [smem:[#allocation31_spill]]  ;;  %s2688_s28 = smov %s2044_s29 }
 0x372   : > { %s2685_s3 = sld [smem:[#allocation32_spill]]  ;;  %s2689_s29 = smov %s2381_s5 }
 0x373   : > { %s2686_s0 = sld [smem:[#allocation34_spill]]  ;;  %s2690_s9 = smov %s2056_s10 }
 0x374   : > { %s2691_s10 = smov %s2368_s13  ;;  %s2692_s11 = smov %s2064_s12 }
 0x375   : > { %s2693_s12 = smov %s2682_s7  ;;  %s2696_s15 = smov %s2088_s18 }
 0x376   : > { %s2694_s13 = smov %s2683_s14  ;;  %s2695_s14 = smov %s2084_s17 }
 0x377   : > { %s2697_s16 = smov %s2092_s19  ;;  %s2698_s17 = smov %s2684_s26 }
 0x378   : > { %s2699_s18 = smov %s2685_s3  ;;  %28 = sbr.rel (!%p2544_p1) target bundleno = 24 (0x18), region = 148 }
 0x379   : > { %s2700_s19 = smov %s2686_s0 }
 0x37d   :  { %1090 = vsyncpa [#allocation4], 1 }
 0x37e   :  { %1092 = vsyncpa [#allocation4 + $0x1], 1 }
 0x37f   :  { %1093 = vsyncpa [#allocation7], 1 }
 0x380   :  { %1095 = vsyncpa [#allocation7 + $0x1], 1 }
 0x381   :  { %1096 = vsyncpa [#allocation10], 1 }
 0x382   :  { %1097 = vsyncpa [#allocation13], 1 }
 0x383   :  { %1098 = vsyncpa [#allocation5], 1 }
 0x384   :  { %1100 = vsyncpa [#allocation5 + $0x1], 1 }

</bundles_post_ra>
